<compile_context>
chip_gen: v7x
topology: tpu7x:2x2x1
jax: 0.10.0
libtpu: 0.0.40
codegen_flags: <defaults>
</compile_context>

<pallas_src>
import math
import numpy as np
import jax
import jax.numpy as jnp
from jax.experimental import pallas as pl
from jax.experimental.pallas import tpu as pltpu


def _round_up(a, m):
    return ((a + m - 1) // m) * m


# ---------------------------------------------------------------------------
# Pallas kernel: one tile of rows at a time, tiny K and full N resident.
# VPU-only compute: bias-initialized accumulator + K broadcast multiply-adds,
# then EUP sin, then a single lane-dense store.
# ---------------------------------------------------------------------------
def _fourier_kernel(x_ref, w_ref, b_ref, o_ref):
    # x_ref: (TM, K)   w_ref: (K, N)   b_ref: (1, N)   o_ref: (TM, N)
    k_dim = x_ref.shape[1]
    x = x_ref[...].astype(jnp.float32)
    w = w_ref[...].astype(jnp.float32)

    # z starts at the (sublane-broadcast) bias, then K unrolled FMAs on the
    # VPU: (TM,1) lane-broadcast * (1,N) sublane-broadcast -> (TM,N).
    z = b_ref[...].astype(jnp.float32) + x[:, 0:1] * w[0:1, :]
    for k in range(1, k_dim):
        z = z + x[:, k:k + 1] * w[k:k + 1, :]

    # Keep sin argument in f32; narrow only at the final store.
    o_ref[...] = jnp.sin(z).astype(o_ref.dtype)


def continuous_fourier_layer(x, weight, bias, *, tile_m=1024, out_dtype=None):
    """y = sin(x @ weight.T + bias)

    x:      (B, in_features) float32
    weight: (out_features, in_features) float32   (PyTorch Linear layout)
    bias:   (out_features,) float32
    out_dtype: output dtype (default: x.dtype).  Pass jnp.bfloat16 to halve
               HBM writeback when the consumer tolerates bf16.
    """
    B, K = x.shape
    N, K2 = weight.shape
    assert K2 == K
    out_dtype = x.dtype if out_dtype is None else out_dtype

    # Glue in plain JAX: W^T (K x N, tiny) and a (1, N) lane-dense bias row.
    w_t = jnp.transpose(weight)          # (K, N)
    b2 = bias.reshape(1, N)

    # Row tile: as large as requested, but keep >= 2 grid steps when possible
    # so both v7x TensorCores get work; tail tile (if any) is masked by Pallas.
    if B <= 8:
        tm = B
    else:
        tm = max(8, min(tile_m, _round_up(pl.cdiv(B, 2), 8)))
    grid = (pl.cdiv(B, tm),)

    return pl.pallas_call(
        _fourier_kernel,
        out_shape=jax.ShapeDtypeStruct((B, N), out_dtype),
        grid_spec=pltpu.PrefetchScalarGridSpec(
            num_scalar_prefetch=0,
            grid=grid,
            in_specs=[
                pl.BlockSpec((tm, K), lambda i: (i, 0)),   # x rows tile
                pl.BlockSpec((K, N), lambda i: (0, 0)),    # full W^T (resident)
                pl.BlockSpec((1, N), lambda i: (0, 0)),    # full bias (resident)
            ],
            out_specs=pl.BlockSpec((tm, N), lambda i: (i, 0)),
        ),
        compiler_params=pltpu.CompilerParams(
            dimension_semantics=("parallel",)
        ),
    )(x, w_t, b2)


# ---------------------------------------------------------------------------
# Deterministic parameter init mirroring the PyTorch __init__ (synthetic).
# ---------------------------------------------------------------------------
def init_params(key, in_features, out_features, weight_scale, lambdas):
    lambda1, lambda2 = lambdas
    if in_features == 2:
        p = np.array([[0, 1], [1, 0], [1, 1], [-1, 1]], dtype=np.float32)
    elif in_features == 3:
        lst = []
        for i in range(-1, 2):
            for j in range(-1, 2):
                lst.append([i, j, 1])
        for i in range(-1, 2):
            lst.append([i, 1, 0])
        lst.append([1, 0, 0])
        p = np.array(lst, dtype=np.float32)
    else:
        raise NotImplementedError

    k_idx, k_w, k_b = jax.random.split(key, 3)
    idx = jax.random.randint(k_idx, (out_features,), 0, p.shape[0])
    r = jnp.asarray(p)[idx]                                    # (out, in)

    u = jax.random.uniform(k_w, (out_features, in_features))   # U[0,1)
    ws = jnp.asarray(weight_scale, dtype=jnp.float32)          # (in,)
    weight = (u * 2.0 * ws - ws) * lambda1 + lambda2 * ws * r  # (out, in)

    bias = jax.random.uniform(
        k_b, (out_features,), minval=-math.pi, maxval=math.pi
    )
    return weight.astype(jnp.float32), bias.astype(jnp.float32)


if __name__ == "__main__":
    key = jax.random.PRNGKey(0)
    k_param, k_x = jax.random.split(key)

    in_features = 3
    out_features = 128
    batch = 256
    weight_scale = [8.0, 8.0, 8.0]
    lambdas = (0.5, 0.5)

    weight, bias = init_params(
        k_param, in_features, out_features, weight_scale, lambdas
    )
    x = jax.random.normal(k_x, (batch, in_features), dtype=jnp.float32)

    # f32 path (module-faithful semantics)
    y = continuous_fourier_layer(x, weight, bias)
    y = jax.block_until_ready(y)

    y_ref = jnp.sin(x @ weight.T + bias)
    assert y.shape == (batch, out_features)
    np.testing.assert_allclose(np.asarray(y), np.asarray(y_ref),
                               rtol=1e-5, atol=5e-5)

    # bf16-output path (halves HBM writeback in the store-bound regime);
    # sin math stays in f32 inside the kernel, only the store is narrowed.
    y_bf16 = jax.block_until_ready(
        continuous_fourier_layer(x, weight, bias, out_dtype=jnp.bfloat16)
    )
    np.testing.assert_allclose(np.asarray(y_bf16).astype(np.float32),
                               np.asarray(y_ref), rtol=0, atol=1e-2)

    print("KERNEL_OK")
</pallas_src>

<mosaic_0001>
module attributes {stable_mosaic.version = 11 : i64} {
  func.func @_fourier_kernel(%arg0: i32, %arg1: memref<128x3xf32, #tpu.memory_space<vmem>>, %arg2: memref<3x128xf32, #tpu.memory_space<vmem>>, %arg3: memref<1x128xf32, #tpu.memory_space<vmem>>, %arg4: memref<128x128xf32, #tpu.memory_space<vmem>>) attributes {dimension_semantics = [#tpu.dimension_semantics<parallel>], iteration_bounds = array<i64: 2>, scalar_prefetch = 0 : i64, scratch_operands = 0 : i64, tpu.core_type = #tpu.core_type<tc>, window_params = [{transform_indices = @transform_0, window_bounds = array<i64: 128, 3>}, {pipeline_mode = #tpu.pipeline_mode<synchronous>, transform_indices = @transform_1, window_bounds = array<i64: 3, 128>}, {pipeline_mode = #tpu.pipeline_mode<synchronous>, transform_indices = @transform_2, window_bounds = array<i64: 1, 128>}, {transform_indices = @transform_3, window_bounds = array<i64: 128, 128>}]} {
    %c0 = arith.constant 0 : index
    %c0_0 = arith.constant 0 : index
    %0 = vector.load %arg1[%c0, %c0_0] : memref<128x3xf32, #tpu.memory_space<vmem>>, vector<128x3xf32>
    %c0_1 = arith.constant 0 : index
    %c0_2 = arith.constant 0 : index
    %1 = vector.load %arg2[%c0_1, %c0_2] : memref<3x128xf32, #tpu.memory_space<vmem>>, vector<3x128xf32>
    %c0_3 = arith.constant 0 : index
    %c0_4 = arith.constant 0 : index
    %2 = vector.load %arg3[%c0_3, %c0_4] : memref<1x128xf32, #tpu.memory_space<vmem>>, vector<1x128xf32>
    %3 = vector.extract_strided_slice %0 {offsets = [0, 0], sizes = [128, 1], strides = [1, 1]} : vector<128x3xf32> to vector<128x1xf32>
    %4 = vector.extract_strided_slice %1 {offsets = [0, 0], sizes = [1, 128], strides = [1, 1]} : vector<3x128xf32> to vector<1x128xf32>
    %5 = vector.broadcast %3 : vector<128x1xf32> to vector<128x128xf32>
    %6 = vector.broadcast %4 : vector<1x128xf32> to vector<128x128xf32>
    %7 = arith.mulf %5, %6 : vector<128x128xf32>
    %8 = vector.broadcast %2 : vector<1x128xf32> to vector<128x128xf32>
    %9 = arith.addf %8, %7 : vector<128x128xf32>
    %10 = vector.extract_strided_slice %0 {offsets = [0, 1], sizes = [128, 1], strides = [1, 1]} : vector<128x3xf32> to vector<128x1xf32>
    %11 = vector.extract_strided_slice %1 {offsets = [1, 0], sizes = [1, 128], strides = [1, 1]} : vector<3x128xf32> to vector<1x128xf32>
    %12 = vector.broadcast %10 : vector<128x1xf32> to vector<128x128xf32>
    %13 = vector.broadcast %11 : vector<1x128xf32> to vector<128x128xf32>
    %14 = arith.mulf %12, %13 : vector<128x128xf32>
    %15 = arith.addf %9, %14 : vector<128x128xf32>
    %16 = vector.extract_strided_slice %0 {offsets = [0, 2], sizes = [128, 1], strides = [1, 1]} : vector<128x3xf32> to vector<128x1xf32>
    %17 = vector.extract_strided_slice %1 {offsets = [2, 0], sizes = [1, 128], strides = [1, 1]} : vector<3x128xf32> to vector<1x128xf32>
    %18 = vector.broadcast %16 : vector<128x1xf32> to vector<128x128xf32>
    %19 = vector.broadcast %17 : vector<1x128xf32> to vector<128x128xf32>
    %20 = arith.mulf %18, %19 : vector<128x128xf32>
    %21 = arith.addf %15, %20 : vector<128x128xf32>
    %22 = math.sin %21 : vector<128x128xf32>
    %c0_5 = arith.constant 0 : index
    %c0_6 = arith.constant 0 : index
    %23 = vector.load %arg4[%c0_5, %c0_6] : memref<128x128xf32, #tpu.memory_space<vmem>>, vector<128x128xf32>
    tpu.vector_store %arg4[%c0_5, %c0_6], %22 {strides = array<i32>} : memref<128x128xf32, #tpu.memory_space<vmem>>, vector<128x128xf32>,
    return
  }
  func.func @transform_0(%arg0: i32) -> (i32, i32) {
    %c0_i32 = arith.constant 0 : i32
    %c0_i32_0 = arith.constant 0 : i32
    return %arg0, %c0_i32 : i32, i32
  }
  func.func @transform_1(%arg0: i32) -> (i32, i32) {
    %c0_i32 = arith.constant 0 : i32
    %c0_i32_0 = arith.constant 0 : i32
    %c0_i32_1 = arith.constant 0 : i32
    return %c0_i32, %c0_i32_0 : i32, i32
  }
  func.func @transform_2(%arg0: i32) -> (i32, i32) {
    %c0_i32 = arith.constant 0 : i32
    %c0_i32_0 = arith.constant 0 : i32
    %c0_i32_1 = arith.constant 0 : i32
    return %c0_i32, %c0_i32_0 : i32, i32
  }
  func.func @transform_3(%arg0: i32) -> (i32, i32) {
    %c0_i32 = arith.constant 0 : i32
    %c0_i32_0 = arith.constant 0 : i32
    return %arg0, %c0_i32 : i32, i32
  }
}

</mosaic_0001>

<bundles_post_ra>
// kernel: tpu_custom_call.1
= control target key start
LH: loop header
LB: loop body
LE: loop exit
PB: predicated region body
PF: predicated region fallthrough
CT: control target
= control target key end

     0   :  { %8 = vsyncpa [#allocation3], 0  ;;  %s4037_s0 = inlined_call_operand.vmem [shape: f32[256,3], index: 0, kind: input, shape index: {}]   ;;  %s4038_s1 = inlined_call_operand.vmem [shape: f32[3,128], index: 1, kind: input, shape index: {}]   ;;  %s4039_s2 = inlined_call_operand.vmem [shape: f32[1,128], index: 2, kind: input, shape index: {}]   ;;  %s4040_s3 = inlined_call_operand.hbm [shape: f32[256,128], index: 3, kind: output, shape index: {}]  }
   0x1   :  { %10 = vsyncpa [#allocation3 + $0x1], 0  ;;  %s2626_s12 = smov 0   ;;  %s2628_s13 = smov 0  }
   0x2   :  { %s2630_s14 = smov 0   ;;  %s2632_s15 = smov 0  }
   0x3 LB: > { %s2647_s16 = sadd.s32 4294967295, %s2592_s15   ;;  %s2268_s17 = sadd.s32 4294967294, %s2592_s15   ;;  %s2592_s15 = sphi %s2632_s15, %s4074_s15   ;;  %s2588_s14 = sphi %s2630_s14, %s4073_s14   ;;  %s2584_s13 = sphi %s2628_s13, %s4072_s13   ;;  %s2580_s12 = sphi %s2626_s12, %s4071_s12  }
   0x4   : > { %s2651_s18 = sadd.s32 1, %s2592_s15   ;;  %s91_s19 = sadd.s32 1, %s2588_s14 }
   0x5   : > { %s88_s20 = ssub.s32 %s2592_s15, %s2651_s18  ;;  %p101_p0 = scmp.ne.s32.totalorder %s2588_s14, %s2584_s13 }
   0x6   : > { %p89_p1 = scmp.eq.s32.totalorder %s88_s20, 0  ;;  %p102_p2 = scmp.eq.s32.totalorder %s2647_s16, 1 }
   0x7   : > { %p107_p3 = scmp.ne.s32.totalorder %s2584_s13, %s2580_s12  ;;  %p108_p4 = scmp.eq.s32.totalorder %s2268_s17, 1 }
   0x8   : > { %s2662_s21 = scalar_select %p89_p1, %s2588_s14, %s91_s19  }
   0x9   : > { %p2664_p5 = por %p102_p2, %p101_p0  ;;  %p2668_p6 = por %p108_p4, %p107_p3 }
   0xa   : > { %p2271_p7 = scmp.ge.s32.totalorder %s2592_s15, 1  ;;  %p141_p8 = scmp.lt.s32.totalorder %s2592_s15, 3 }
   0xc   : > { %p142_p9 = pnand %p2271_p7, %p141_p8 }
   0xd   : > { %s2273_s24 = sshll.u32 (!%p142_p9), %s2647_s16, 4  ;;  %v2594_v0 = vmov (!%p142_p9), 0   ;;  %v2595_v17 = vmov (!%p142_p9), 1   ;;  %v2596_v18 = vmov (!%p142_p9), 2   ;;  %v270_v19 = vlaneseq (!%p142_p9)  ;;  %v2684_v22 = vld [vmem:[%s4038_s1] sm:$0x7] (!%p142_p9) }
   0xe   : > { %145 = sbr.rel (%p142_p9) target bundleno = 673 (0x2a1), region = 32  ;;  %2461 = vset.pattern.permute.xlu1 (!%p142_p9), %v2594_v0  ;;  %2460 = vset.pattern.permute.xlu0 (!%p142_p9), %v2594_v0  ;;  %p166_p10 = scmp.lt.s32.totalorder (!%p142_p9), %s2273_s24, 31  ;;  %v2699_v29 = vld [vmem:[%s4039_s2] ss:$0 sm:$0xff] (!%p142_p9) }
   0xf   : > { %v2678_v20 = vshrl.u32 (!%p142_p9), %v270_v19, 7  ;;  %s162_s6 = sand.u32 (!%p142_p9), 1, %s2584_s13   ;;  %s2345_s9 = sshll.u32 (!%p142_p9), %s2647_s16, 11 }
  0x10   : > { %s2272_s7 = sshll.u32 (!%p142_p9), %s162_s6, 7  ;;  %s3988_s19 = scalar_lea.hbm (!%p142_p9), %s4040_s3, %s2345_s9 }
  0x11   : > { %v272_v21 = vsub.s32 (!%p142_p9), 0, %v2678_v20  ;;  %s3045_s8 = scalar_lea.vmem (!%p142_p9), [#allocation2], %s2272_s7  ;;  %s3996_s16 = scalar_lea.sflag (!%p142_p9), [#allocation3], %s162_s6 }
  0x12   : > { %s2206_s10 = sshll.u32 (!%p142_p9), %s3045_s8, 4  ;;  %s3990_s10 = int_to_ptr.vmem [resolvable:$true] %s2206_s10 }
  0x13   : > { %v2691_v25 = vrot.slane (!%p142_p9), %v2684_v22, %v272_v21  ;;  %s2530_s20 = scalar_lea.vmem (!%p142_p9), %s3990_s10, 2048 }
  0x14   : > { %p2531_p11 = scmp.ne.s32.totalorder (!%p142_p9), %s3990_s10, %s2530_s20 }
  0x15   : > { %s4076_s24 = smov (!%p166_p10, %s2273_s24), 31 }
  0x16   : > { %s2274_s25 = sshll.u32 %s4076_s24, 3  ;;  %p2532_p12 = pnand %p2531_p11, %p2664_p5 }
  0x17   : > { %s169_s28 = scalar_lea.vmem %s4037_s0, %s2274_s25  ;;  %s2603_s24 = smov [#allocation2]  }
  0x18   : > { %v174_v1 = vld [vmem:[%s169_s28 + $0x10] sm:$0xff]  ;;  %v172_v2 = vld [vmem:[%s169_s28] sm:$0xff]  ;;  %v175_v3 = vld [vmem:[%s169_s28 + $0x18] sm:$0xff]  ;;  %p2533_p13 = pneg %p2532_p12  ;;  %s2534_s25 = sshll.u32 %s2603_s24, 4  ;;  %s2535_s25 = int_to_ptr.vmem [resolvable:$false] %s2534_s25 }
  0x19   : > { %202 = vperm.xlu1 %2461, %v174_v1   ;;  %192 = vperm.xlu0 %2460, %v172_v2   ;;  %v173_v4 = vld [vmem:[%s169_s28 + $0x8] sm:$0xff]  ;;  %v176_v6 = vld [vmem:[%s169_s28 + $0x20] sm:$0xff]  ;;  %v179_v7 = vld [vmem:[%s169_s28 + $0x38] sm:$0xff]  ;;  %s2536_s26 = scalar_lea.vmem %s2535_s25, 4096  ;;  %p2537_p0 = scmp.lt.s32.totalorder %s3990_s10, %s2535_s25 }
  0x1a   : > { %v177_v5 = vld [vmem:[%s169_s28 + $0x28] sm:$0xff]  ;;  %v178_v8 = vld [vmem:[%s169_s28 + $0x30] sm:$0xff]  ;;  %v180_v10 = vld [vmem:[%s169_s28 + $0x40] sm:$0xff]  ;;  %p2538_p1 = scmp.lt.s32.totalorder %s2536_s26, %s2530_s20 }
  0x1b   : > { %v181_v9 = vld [vmem:[%s169_s28 + $0x48] sm:$0xff]  ;;  %v183_v11 = vld [vmem:[%s169_s28 + $0x58] sm:$0xff]  ;;  %v182_v12 = vld [vmem:[%s169_s28 + $0x50] sm:$0xff] }
  0x1c   : > { %v185_v13 = vld [vmem:[%s169_s28 + $0x68] sm:$0xff]  ;;  %v184_v14 = vld [vmem:[%s169_s28 + $0x60] sm:$0xff]  ;;  %v187_v15 = vld [vmem:[%s169_s28 + $0x78] sm:$0xff]  ;;  %p2539_p2 = por %p2538_p1, %p2537_p0 }
  0x1d   : > { %207 = vperm.xlu1 %2461, %v175_v3   ;;  %197 = vperm.xlu0 %2460, %v173_v4   ;;  %v186_v16 = vld [vmem:[%s169_s28 + $0x70] sm:$0xff] }
  0x1e   : > { %p2540_p3 = pnand %p2539_p2, %p2533_p13 }
  0x21   : > { %217 = vperm.xlu1 %2461, %v177_v5   ;;  %212 = vperm.xlu0 %2460, %v176_v6  }
  0x25   : > { %227 = vperm.xlu1 %2461, %v179_v7   ;;  %222 = vperm.xlu0 %2460, %v178_v8  }
  0x29   : > { %237 = vperm.xlu1 %2461, %v181_v9   ;;  %232 = vperm.xlu0 %2460, %v180_v10  }
  0x2d   : > { %247 = vperm.xlu1 %2461, %v183_v11   ;;  %242 = vperm.xlu0 %2460, %v182_v12  }
  0x31   : > { %257 = vperm.xlu1 %2461, %v185_v13   ;;  %252 = vperm.xlu0 %2460, %v184_v14  }
  0x35   : > { %267 = vperm.xlu1 %2461, %v187_v15   ;;  %262 = vperm.xlu0 %2460, %v186_v16  }
  0x39   : > { %2463 = vset.pattern.permute.xlu1 %v2595_v17  ;;  %2462 = vset.pattern.permute.xlu0 %v2595_v17 }
  0x3a   : > { %317 = vperm.xlu1 %2463, %v173_v4   ;;  %313 = vperm.xlu0 %2462, %v172_v2  }
  0x3e   : > { %321 = vperm.xlu1 %2463, %v174_v1   ;;  %325 = vperm.xlu0 %2462, %v175_v3  }
  0x42   : > { %329 = vperm.xlu1 %2463, %v176_v6   ;;  %333 = vperm.xlu0 %2462, %v177_v5  }
  0x46   : > { %337 = vperm.xlu1 %2463, %v178_v8   ;;  %341 = vperm.xlu0 %2462, %v179_v7  }
  0x4a   : > { %345 = vperm.xlu1 %2463, %v180_v10   ;;  %349 = vperm.xlu0 %2462, %v181_v9  }
  0x4e   : > { %353 = vperm.xlu1 %2463, %v182_v12   ;;  %357 = vperm.xlu0 %2462, %v183_v11  }
  0x52   : > { %361 = vperm.xlu1 %2463, %v184_v14   ;;  %365 = vperm.xlu0 %2462, %v185_v13  }
  0x56   : > { %369 = vperm.xlu1 %2463, %v186_v16   ;;  %373 = vperm.xlu0 %2462, %v187_v15  }
  0x5a   : > { %2464 = vset.pattern.permute.xlu1 %v2596_v18  ;;  %2465 = vset.pattern.permute.xlu0 %v2596_v18 }
  0x5b   : > { %413 = vperm.xlu1 %2464, %v172_v2   ;;  %417 = vperm.xlu0 %2465, %v173_v4  }
  0x5f   : > { %421 = vperm.xlu1 %2464, %v174_v1   ;;  %429 = vperm.xlu0 %2465, %v176_v6   ;;  %v378_v1 = vsub.s32 1, %v2678_v20 }
  0x61   : > { %v379_v4 = vrot.slane %v2684_v22, %v378_v1 }
  0x63   : > { %425 = vperm.xlu1 %2464, %v175_v3   ;;  %437 = vperm.xlu0 %2465, %v178_v8  }
  0x67   : > { %433 = vperm.xlu1 %2464, %v177_v5   ;;  %445 = vperm.xlu0 %2465, %v180_v10  }
  0x6b   : > { %441 = vperm.xlu1 %2464, %v179_v7   ;;  %453 = vperm.xlu0 %2465, %v182_v12  }
  0x6f   : > { %449 = vperm.xlu1 %2464, %v181_v9   ;;  %461 = vperm.xlu0 %2465, %v184_v14  }
  0x73   : > { %457 = vperm.xlu1 %2464, %v183_v11   ;;  %469 = vperm.xlu0 %2465, %v186_v16  }
  0x77   : > { %465 = vperm.xlu1 %2464, %v185_v13  }
  0x7b   : > { %473 = vperm.xlu1 %2464, %v187_v15  }
  0x98   : > { %v2686_v23 = vpop.permute.xlu1 %202  ;;  %v2688_v24 = vpop.permute.xlu0 %192 }
  0x9c   : > { %v208_v26 = vpop.permute.xlu1 %207  ;;  %v2693_v27 = vpop.permute.xlu0 %197 }
  0x9d   : > { %v277_v28 = vmul.f32 %v2691_v25, %v208_v26 }
  0x9f   : > { %v299_v30 = vadd.f32 %v2699_v29, %v277_v28 }
  0xa0   : > { %v218_v31 = vpop.permute.xlu1 %217  ;;  %v213_v32 = vpop.permute.xlu0 %212 }
  0xa1   : > { %v279_v33 = vmul.f32 %v2691_v25, %v218_v31  ;;  %v278_v7 = vmul.f32 %v2691_v25, %v213_v32 }
  0xa3   : > { %v301_v34 = vadd.f32 %v2699_v29, %v279_v33  ;;  %v300_v12 = vadd.f32 %v2699_v29, %v278_v7 }
  0xa4   : > { %v228_v35 = vpop.permute.xlu1 %227  ;;  %v223_v36 = vpop.permute.xlu0 %222 }
  0xa5   : > { %v281_v37 = vmul.f32 %v2691_v25, %v228_v35  ;;  %v280_v38 = vmul.f32 %v2691_v25, %v223_v36 }
  0xa7   : > { %v303_v39 = vadd.f32 %v2699_v29, %v281_v37  ;;  %v302_v40 = vadd.f32 %v2699_v29, %v280_v38 }
  0xa8   : > { %v238_v41 = vpop.permute.xlu1 %237  ;;  %v233_v42 = vpop.permute.xlu0 %232 }
  0xa9   : > { %v283_v43 = vmul.f32 %v2691_v25, %v238_v41  ;;  %v282_v44 = vmul.f32 %v2691_v25, %v233_v42 }
  0xab   : > { %v305_v45 = vadd.f32 %v2699_v29, %v283_v43  ;;  %v304_v46 = vadd.f32 %v2699_v29, %v282_v44 }
  0xac   : > { %v248_v47 = vpop.permute.xlu1 %247  ;;  %v243_v48 = vpop.permute.xlu0 %242 }
  0xad   : > { %v285_v49 = vmul.f32 %v2691_v25, %v248_v47  ;;  %v284_v50 = vmul.f32 %v2691_v25, %v243_v48  ;;  %v478_v48 = vsub.s32 2, %v2678_v20 }
  0xaf   : > { %v307_v51 = vadd.f32 %v2699_v29, %v285_v49  ;;  %v306_v52 = vadd.f32 %v2699_v29, %v284_v50  ;;  %v275_v50 = vmul.f32 %v2691_v25, %v2693_v27  ;;  %v276_v27 = vmul.f32 %v2691_v25, %v2686_v23 }
  0xb0   : > { %v258_v53 = vpop.permute.xlu1 %257  ;;  %v253_v54 = vpop.permute.xlu0 %252 }
  0xb1   : > { %v287_v55 = vmul.f32 %v2691_v25, %v258_v53  ;;  %v286_v56 = vmul.f32 %v2691_v25, %v253_v54  ;;  %v298_v7 = vadd.f32 %v2699_v29, %v276_v27  ;;  %v2600_v27 = vmov 2102212464  }
  0xb3   : > { %v309_v57 = vadd.f32 %v2699_v29, %v287_v55  ;;  %v308_v58 = vadd.f32 %v2699_v29, %v286_v56 }
  0xb4   : > { %v268_v59 = vpop.permute.xlu1 %267  ;;  %v263_v60 = vpop.permute.xlu0 %262 }
  0xb5   : > { %v289_v61 = vmul.f32 %v2691_v25, %v268_v59  ;;  %v288_v62 = vmul.f32 %v2691_v25, %v263_v60  ;;  %v2756_v59 = vrot.slane %v2684_v22, %v478_v48 }
  0xb7   : > { %v311_v63 = vadd.f32 %v2699_v29, %v289_v61  ;;  %v310_v0 = vadd.f32 %v2699_v29, %v288_v62 }
  0xb9   : > { %v318_v2 = vpop.permute.xlu1 %317  ;;  %v314_v3 = vpop.permute.xlu0 %313 }
  0xba   : > { %v381_v55 = vmul.f32 %v379_v4, %v318_v2  ;;  %v380_v56 = vmul.f32 %v379_v4, %v314_v3 }
  0xbd   : > { %v322_v5 = vpop.permute.xlu1 %321  ;;  %v326_v6 = vpop.permute.xlu0 %325 }
  0xbe   : > { %v383_v8 = vmul.f32 %v379_v4, %v326_v6  ;;  %v382_v3 = vmul.f32 %v379_v4, %v322_v5 }
  0xc0   : > { %v2727_v9 = vadd.f32 %v383_v8, %v299_v30 }
  0xc1   : > { %v330_v10 = vpop.permute.xlu1 %329  ;;  %v334_v11 = vpop.permute.xlu0 %333 }
  0xc2   : > { %v384_v13 = vmul.f32 %v379_v4, %v330_v10  ;;  %v385_v14 = vmul.f32 %v379_v4, %v334_v11  ;;  %v398_v11 = vadd.f32 %v382_v3, %v298_v7  ;;  %v2602_v7 = vmov 1326507024  }
  0xc4   : > { %v2730_v15 = vadd.f32 %v384_v13, %v300_v12  ;;  %v2732_v16 = vadd.f32 %v385_v14, %v301_v34 }
  0xc5   : > { %v338_v17 = vpop.permute.xlu1 %337  ;;  %v342_v18 = vpop.permute.xlu0 %341 }
  0xc6   : > { %v386_v19 = vmul.f32 %v379_v4, %v338_v17  ;;  %v387_v21 = vmul.f32 %v379_v4, %v342_v18 }
  0xc8   : > { %v2734_v26 = vadd.f32 %v386_v19, %v302_v40  ;;  %v2736_v28 = vadd.f32 %v387_v21, %v303_v39 }
  0xc9   : > { %v346_v30 = vpop.permute.xlu1 %345  ;;  %v350_v31 = vpop.permute.xlu0 %349 }
  0xca   : > { %v388_v32 = vmul.f32 %v379_v4, %v346_v30  ;;  %v389_v33 = vmul.f32 %v379_v4, %v350_v31 }
  0xcc   : > { %v2738_v35 = vadd.f32 %v388_v32, %v304_v46  ;;  %v2740_v36 = vadd.f32 %v389_v33, %v305_v45  ;;  %v274_v45 = vmul.f32 %v2691_v25, %v2688_v24  ;;  %v297_v24 = vadd.f32 %v2699_v29, %v275_v50 }
  0xcd   : > { %v354_v37 = vpop.permute.xlu1 %353  ;;  %v358_v38 = vpop.permute.xlu0 %357 }
  0xce   : > { %v390_v34 = vmul.f32 %v379_v4, %v354_v37  ;;  %v391_v41 = vmul.f32 %v379_v4, %v358_v38  ;;  %v397_v62 = vadd.f32 %v381_v55, %v297_v24  ;;  %v2598_v55 = vmov 2475754826  }
  0xd0   : > { %v2742_v42 = vadd.f32 %v390_v34, %v306_v52  ;;  %v2744_v43 = vadd.f32 %v391_v41, %v307_v51 }
  0xd1   : > { %v362_v40 = vpop.permute.xlu1 %361  ;;  %v366_v44 = vpop.permute.xlu0 %365 }
  0xd2   : > { %v392_v39 = vmul.f32 %v379_v4, %v362_v40  ;;  %v393_v47 = vmul.f32 %v379_v4, %v366_v44 }
  0xd4   : > { %v2747_v49 = vadd.f32 %v392_v39, %v308_v58  ;;  %v2749_v46 = vadd.f32 %v393_v47, %v309_v57  ;;  %v296_v57 = vadd.f32 %v2699_v29, %v274_v45 }
  0xd5   : > { %v370_v52 = vpop.permute.xlu1 %369  ;;  %v374_v53 = vpop.permute.xlu0 %373 }
  0xd6   : > { %v394_v51 = vmul.f32 %v379_v4, %v370_v52  ;;  %v395_v54 = vmul.f32 %v379_v4, %v374_v53  ;;  %v396_v1 = vadd.f32 %v380_v56, %v296_v57  ;;  %v2597_v52 = vmov 683565275  }
  0xd7   : > { %v2599_v57 = vmov 2131351028  }
  0xd8   : > { %v2758_v20 = vadd.f32 %v394_v51, %v310_v0  ;;  %v2760_v58 = vadd.f32 %v395_v54, %v311_v63 }
  0xda   : > { %v414_v60 = vpop.permute.xlu1 %413  ;;  %v418_v61 = vpop.permute.xlu0 %417 }
  0xdb   : > { %v480_v2 = vmul.f32 %v2756_v59, %v414_v60  ;;  %v481_v22 = vmul.f32 %v2756_v59, %v418_v61  ;;  %v2601_v61 = vmov 920167782  }
  0xdd   : > { %v2768_v0 = vadd.f32 %v480_v2, %v396_v1  ;;  %v2770_v63 = vadd.f32 %v481_v22, %v397_v62 }
  0xde   : > { %v422_v6 = vpop.permute.xlu1 %421  ;;  %v430_v33 = vpop.permute.xlu0 %429 }
  0xdf   : > { %v512_v8 = vand.u32 2147483647, %v2768_v0  ;;  %v515_v23 = vand.u32 2139095040, %v2768_v0  ;;  %v616_v25 = vand.u32 2147483647, %v2770_v63  ;;  %v619_v10 = vand.u32 2139095040, %v2770_v63 }
  0xe0   : > { %v482_v13 = vmul.f32 %v2756_v59, %v422_v6  ;;  %v2786_v44 = vmul.f32 %v2756_v59, %v430_v33  ;;  %vm514_vm13 = vcmp.lt.s32.totalorder %v2768_v0, 0  ;;  %vm618_vm14 = vcmp.lt.s32.totalorder %v2770_v63, 0 }
  0xe1   : > { %v516_v12 = vshrl.u32 %v515_v23, 23  ;;  %v519_v4 = vand.u32 8388607, %v512_v8  ;;  %v620_v5 = vshrl.u32 %v619_v10, 23  ;;  %v623_v14 = vand.u32 8388607, %v616_v25 }
  0xe2   : > { %v2782_v17 = vadd.f32 %v482_v13, %v398_v11 }
  0xe3   : > { %v2276_v29 = vadd.s32 4294967169, %v516_v12  ;;  %v2280_v18 = vadd.s32 4294967169, %v620_v5  ;;  %v520_v21 = vor.u32 8388608, %v519_v4  ;;  %v624_v30 = vor.u32 8388608, %v623_v14 }
  0xe4   : > { %v723_v32 = vand.u32 2139095040, %v2782_v17  ;;  %v720_v45 = vand.u32 2147483647, %v2782_v17 }
  0xe5   : > { %v522_v19 = vadd.s32 1, %v2276_v29  ;;  %v626_v31 = vadd.s32 1, %v2280_v18  ;;  %v2788_v39 = vshll.u32 %v520_v21, 8  ;;  %v2792_v48 = vshll.u32 %v624_v30, 8 }
  0xe6   : > { %v724_v38 = vshrl.u32 %v723_v32, 23 }
  0xe7   : > { %vm523_vm0 = vcmp.gt.s32.totalorder %v522_v19, 0  ;;  %vm627_vm1 = vcmp.gt.s32.totalorder %v626_v31, 0 }
  0xe8   : > { %v524_v37 = vsel %vm523_vm0, %v522_v19, 0  ;;  %v628_v40 = vsel %vm627_vm1, %v626_v31, 0  ;;  %v2796_v54 = vadd.s32 4294967169, %v724_v38  ;;  %vm2904_vm1 = vcmp.le.f32.partialorder %v512_v8, 0.7853982 }
  0xe9   : > { %v525_v34 = vshrl.u32 %v524_v37, 5  ;;  %v526_v41 = vand.u32 31, %v524_v37  ;;  %v2790_v47 = vshrl.u32 %v628_v40, 5  ;;  %v630_v51 = vand.u32 31, %v628_v40 }
  0xeb   : > { %v527_v50 = vsub.s32 32, %v526_v41  ;;  %v529_v53 = vshll.u32 %v2597_v52, %v526_v41  ;;  %v532_v56 = vshll.u32 %v2598_v55, %v526_v41  ;;  %v535_v24 = vshll.u32 %v2599_v57, %v526_v41 }
  0xec   : > { %v538_v60 = vshll.u32 %v2600_v27, %v526_v41  ;;  %v541_v62 = vshll.u32 %v2601_v61, %v526_v41  ;;  %vm544_vm2 = vcmp.lt.s32.totalorder %v525_v34, 1  ;;  %vm545_vm3 = vcmp.lt.s32.totalorder %v525_v34, 2 }
  0xed   : > { %v530_v1 = vshrl.u32 %v2598_v55, %v527_v50  ;;  %v533_v2 = vshrl.u32 %v2599_v57, %v527_v50  ;;  %v536_v22 = vshrl.u32 %v2600_v27, %v527_v50  ;;  %v528_v3 = vshrl.u32 %v2597_v52, %v527_v50 }
  0xee   : > { %v539_v6 = vshrl.u32 %v2601_v61, %v527_v50  ;;  %v542_v23 = vshrl.u32 %v2602_v7, %v527_v50  ;;  %v631_v13 = vsub.s32 32, %v630_v51  ;;  %vm546_vm4 = vcmp.lt.s32.totalorder %v525_v34, 3 }
  0xef   : > { %v531_v10 = vor.u32 %v530_v1, %v529_v53  ;;  %v534_v11 = vor.u32 %v533_v2, %v532_v56  ;;  %v537_v12 = vor.u32 %v536_v22, %v535_v24  ;;  %vm547_vm5 = vcmp.lt.s32.totalorder %v525_v34, 4 }
  0xf0   : > { %v540_v4 = vor.u32 %v539_v6, %v538_v60  ;;  %v543_v5 = vor.u32 %v542_v23, %v541_v62  ;;  %v633_v32 = vshll.u32 %v2597_v52, %v630_v51  ;;  %v634_v38 = vshrl.u32 %v2598_v55, %v631_v13 }
  0xf1   : > { %v548_v14 = vsel %vm544_vm2, %v528_v3, %v531_v10  ;;  %v549_v29 = vsel %vm547_vm5, %v537_v12, 2102212464  ;;  %v552_v18 = vsel %vm544_vm2, %v531_v10, %v534_v11  ;;  %v556_v19 = vsel %vm544_vm2, %v534_v11, %v537_v12 }
  0xf2   : > { %v550_v21 = vsel %vm546_vm4, %v534_v11, %v549_v29  ;;  %v553_v30 = vsel %vm547_vm5, %v540_v4, 920167782  ;;  %v557_v31 = vsel %vm547_vm5, %v543_v5, 1326507024  ;;  %v636_v41 = vshll.u32 %v2598_v55, %v630_v51 }
  0xf3   : > { %v554_v33 = vsel %vm546_vm4, %v537_v12, %v553_v30  ;;  %v558_v37 = vsel %vm546_vm4, %v540_v4, %v557_v31  ;;  %v551_v40 = vsel %vm545_vm3, %v548_v14, %v550_v21  ;;  %v637_v56 = vshrl.u32 %v2599_v57, %v631_v13 }
  0xf4   : > { %v555_v50 = vsel %vm545_vm3, %v552_v18, %v554_v33  ;;  %v559_v53 = vsel %vm545_vm3, %v556_v19, %v558_v37  ;;  %v635_v2 = vor.u32 %v634_v38, %v633_v32  ;;  %v639_v3 = vshll.u32 %v2599_v57, %v630_v51 }
  0xf5   : > { %v2819_v24 = vmul.u32.u64.low %v2788_v39, %v559_v53  ;;  %v2820_v60 = vmul.u32.u64.high %v2788_v39, %v559_v53, %v2819_v24  ;;  %v2823_v62 = vmul.u32.u64.low %v2788_v39, %v555_v50  ;;  %v2824_v1 = vmul.u32.u64.high %v2788_v39, %v555_v50, %v2823_v62 }
  0xf6   : > { %v638_v22 = vor.u32 %v637_v56, %v636_v41  ;;  %v640_v6 = vshrl.u32 %v2600_v27, %v631_v13  ;;  %v632_v23 = vshrl.u32 %v2597_v52, %v631_v13  ;;  %v642_v34 = vshll.u32 %v2600_v27, %v630_v51 }
  0xf7   : > { %v643_v10 = vshrl.u32 %v2601_v61, %v631_v13  ;;  %v646_v11 = vshrl.u32 %v2602_v7, %v631_v13  ;;  %v567_v12 = vmul.u32 %v2788_v39, %v551_v40  ;;  %v645_v5 = vshll.u32 %v2601_v61, %v630_v51 }
  0xf8   : > { %v641_v4 = vor.u32 %v640_v6, %v639_v3  ;;  %vm648_vm6 = vcmp.lt.s32.totalorder %v2790_v47, 1  ;;  %vm569_vm7 = vc.u32 %v2820_v60, %v2823_v62  ;;  %v570_v14 = vadd.s32 1, %v2824_v1 }
  0xf9   : > { %v644_v29 = vor.u32 %v643_v10, %v642_v34  ;;  %vm649_vm8 = vcmp.lt.s32.totalorder %v2790_v47, 2  ;;  %v647_v18 = vor.u32 %v646_v11, %v645_v5  ;;  %vm650_vm9 = vcmp.lt.s32.totalorder %v2790_v47, 3 }
  0xfa   : > { %vm651_vm10 = vcmp.lt.s32.totalorder %v2790_v47, 4  ;;  %v656_v13 = vsel %vm648_vm6, %v635_v2, %v638_v22  ;;  %v571_v39 = vsel %vm569_vm7, %v570_v14, %v2824_v1  ;;  %v660_v51 = vsel %vm648_vm6, %v638_v22, %v641_v4  ;;  %v426_v14 = vpop.permute.xlu1 %425 }
  0xfb   : > { %v653_v19 = vsel %vm651_vm10, %v641_v4, 2102212464  ;;  %v657_v21 = vsel %vm651_vm10, %v644_v29, 920167782  ;;  %v572_v30 = vadd.s32 %v571_v39, %v567_v12  ;;  %v652_v31 = vsel %vm648_vm6, %v632_v23, %v635_v2 }
  0xfc   : > { %v658_v32 = vsel %vm650_vm9, %v641_v4, %v657_v21  ;;  %v661_v33 = vsel %vm651_vm10, %v647_v18, 1326507024  ;;  %v654_v37 = vsel %vm650_vm9, %v638_v22, %v653_v19  ;;  %v730_v40 = vadd.s32 1, %v2796_v54 }
  0xfd   : > { %v659_v38 = vsel %vm649_vm8, %v656_v13, %v658_v32  ;;  %v662_v41 = vsel %vm650_vm9, %v644_v29, %v661_v33  ;;  %v573_v50 = vadd.s32 536870912, %v572_v30  ;;  %v727_v22 = vand.u32 8388607, %v720_v45 }
  0xfe   : > { %v663_v53 = vsel %vm649_vm8, %v660_v51, %v662_v41  ;;  %v2847_v56 = vmul.u32.u64.low %v2792_v48, %v659_v38  ;;  %v2848_v24 = vmul.u32.u64.high %v2792_v48, %v659_v38, %v2847_v56  ;;  %vm731_vm11 = vcmp.gt.s32.totalorder %v730_v40, 0 }
  0xff   : > { %v2852_v1 = vmul.u32.u64.low %v2792_v48, %v663_v53  ;;  %v2853_v2 = vmul.u32.u64.high %v2792_v48, %v663_v53, %v2852_v1  ;;  %v574_v3 = vshrl.u32 %v573_v50, 30  ;;  %v655_v54 = vsel %vm649_vm8, %v652_v31, %v654_v37 }
 0x100   : > { %v732_v6 = vsel %vm731_vm11, %v730_v40, 0  ;;  %v674_v10 = vadd.s32 1, %v2848_v24  ;;  %v2862_v11 = vadd.f32 %v2786_v44, %v2730_v15  ;;  %v671_v12 = vmul.u32 %v2792_v48, %v655_v54 }
 0x101   : > { %v734_v23 = vand.u32 31, %v732_v6  ;;  %v575_v34 = vshll.u32 %v574_v3, 30  ;;  %vm673_vm12 = vc.u32 %v2853_v2, %v2847_v56  ;;  %v728_v4 = vor.u32 8388608, %v727_v22 }
 0x102   : > { %v675_v47 = vsel %vm673_vm12, %v674_v10, %v2848_v24  ;;  %v568_v13 = vadd.s32 %v2823_v62, %v2820_v60  ;;  %v928_v44 = vand.u32 2147483647, %v2862_v11  ;;  %v2875_v48 = vmul.f32 %v2756_v59, %v426_v14 }
 0x103   : > { %v735_v5 = vsub.s32 32, %v734_v23  ;;  %v2867_v29 = vsub.s32 %v572_v30, %v575_v34  ;;  %v676_v18 = vadd.s32 %v675_v47, %v671_v12  ;;  %v2878_v21 = vshll.u32 %v728_v4, 8 }
 0x104   : > { %v931_v51 = vand.u32 2139095040, %v2862_v11  ;;  %v2882_v31 = vshrl.u32 %v732_v6, 5  ;;  %v598_v32 = vsub.s32 4, %v574_v3  ;;  %v737_v37 = vshll.u32 %v2597_v52, %v734_v23 }
 0x105   : > { %v578_v15 = vsub.s32 0, %v2867_v29  ;;  %v677_v39 = vadd.s32 536870912, %v676_v18  ;;  %v738_v19 = vshrl.u32 %v2598_v55, %v735_v5  ;;  %v741_v60 = vshrl.u32 %v2599_v57, %v735_v5 }
 0x106   : > { %v744_v62 = vshrl.u32 %v2600_v27, %v735_v5  ;;  %v747_v38 = vshrl.u32 %v2601_v61, %v735_v5  ;;  %v740_v40 = vshll.u32 %v2598_v55, %v734_v23  ;;  %v743_v50 = vshll.u32 %v2599_v57, %v734_v23 }
 0x107   : > { %v2277_v30 = vmin.u32 %v578_v15, %v2867_v29  ;;  %v678_v33 = vshrl.u32 %v677_v39, 30  ;;  %v750_v53 = vshrl.u32 %v2602_v7, %v735_v5  ;;  %v739_v1 = vor.u32 %v738_v19, %v737_v37 }
 0x108   : > { %v746_v22 = vshll.u32 %v2600_v27, %v734_v23  ;;  %v932_v54 = vshrl.u32 %v931_v51, 23  ;;  %v742_v34 = vor.u32 %v741_v60, %v740_v40  ;;  %v745_v10 = vor.u32 %v744_v62, %v743_v50 }
 0x109   : > { %v580_v41 = vclz %v2277_v30  ;;  %v679_v24 = vshll.u32 %v678_v33, 30  ;;  %v749_v12 = vshll.u32 %v2601_v61, %v734_v23  ;;  %v2895_v4 = vsel %vm514_vm13, %v598_v32, %v574_v3 }
 0x10a   : > { %v736_v47 = vshrl.u32 %v2597_v52, %v735_v5  ;;  %v748_v15 = vor.u32 %v747_v38, %v746_v22  ;;  %v702_v39 = vsub.s32 4, %v678_v33  ;;  %vm752_vm0 = vcmp.lt.s32.totalorder %v2882_v31, 1 }
 0x10b   : > { %v2278_v6 = vadd.s32 4294967294, %v580_v41  ;;  %v2898_v14 = vsub.s32 %v676_v18, %v679_v24  ;;  %v751_v19 = vor.u32 %v750_v53, %v749_v12  ;;  %vm754_vm2 = vcmp.lt.s32.totalorder %v2882_v31, 3 }
 0x10c   : > { %vm755_vm3 = vcmp.lt.s32.totalorder %v2882_v31, 4  ;;  %vm2913_vm4 = vcmp.le.f32.partialorder %v616_v25, 0.7853982  ;;  %v760_v8 = vsel %vm752_vm0, %v739_v1, %v742_v34  ;;  %v764_v38 = vsel %vm752_vm0, %v742_v34, %v745_v10 }
 0x10d   : > { %vm2279_vm15 = vcmp.lt.s32.totalorder %v2278_v6, 0  ;;  %v682_v51 = vsub.s32 0, %v2898_v14  ;;  %v757_v60 = vsel %vm755_vm3, %v745_v10, 2102212464  ;;  %v761_v37 = vsel %vm755_vm3, %v748_v15, 920167782 }
 0x10e   : > { %v583_v3 = vsel %vm2279_vm15, 0, %v2278_v6  ;;  %v762_v25 = vsel %vm754_vm2, %v745_v10, %v761_v37  ;;  %v765_v50 = vsel %vm755_vm3, %v751_v19, 1326507024  ;;  %vm753_vm5 = vcmp.lt.s32.totalorder %v2882_v31, 2 }
 0x10f   : > { %v584_v5 = vsub.s32 32, %v583_v3  ;;  %v588_v18 = vsub.s32 4294967266, %v583_v3  ;;  %v585_v62 = vshll.u32 %v2867_v29, %v583_v3  ;;  %v2281_v32 = vmin.u32 %v682_v51, %v2898_v14 }
 0x110   : > { %v756_v24 = vsel %vm752_vm0, %v736_v47, %v739_v1  ;;  %v758_v29 = vsel %vm754_vm2, %v742_v34, %v757_v60  ;;  %v763_v12 = vsel %vm753_vm5, %v760_v8, %v762_v25  ;;  %v672_v34 = vadd.s32 %v2847_v56, %v2853_v2 }
 0x111   : > { %v586_v41 = vshrl.u32 %v568_v13, %v584_v5  ;;  %v589_v40 = vadd.s32 127, %v588_v18  ;;  %v684_v53 = vclz %v2281_v32  ;;  %v766_v13 = vsel %vm754_vm2, %v748_v15, %v765_v50 }
 0x112   : > { %v767_v51 = vsel %vm753_vm5, %v764_v38, %v766_v13  ;;  %v2933_v10 = vmul.u32.u64.low %v2878_v21, %v763_v12  ;;  %v2934_v19 = vmul.u32.u64.high %v2878_v21, %v763_v12, %v2933_v10  ;;  %v703_v18 = vsel %vm618_vm14, %v702_v39, %v678_v33 }
 0x113   : > { %v587_v22 = vor.u32 %v586_v41, %v585_v62  ;;  %v590_v6 = vshll.u32 %v589_v40, 23  ;;  %v2282_v3 = vadd.s32 4294967294, %v684_v53  ;;  %v759_v31 = vsel %vm753_vm5, %v756_v24, %v758_v29  ;;  %v438_v29 = vpop.permute.xlu0 %437 }
 0x114   : > { %v2939_v1 = vmul.u32.u64.low %v2878_v21, %v767_v51  ;;  %v2940_v47 = vmul.u32.u64.high %v2878_v21, %v767_v51, %v2939_v1  ;;  %v2292_v15 = vadd.s32 4294967169, %v932_v54  ;;  %v601_v62 = vsel %vm2904_vm1, 0, %v2895_v4 }
 0x115   : > { %v591_v5 = vor.u32 4788187, %v590_v6  ;;  %vm2283_vm6 = vcmp.lt.s32.totalorder %v2282_v3, 0  ;;  %v594_v8 = vcvt.s32.f32 %v587_v22  ;;  %v705_v33 = vsel %vm2913_vm4, 0, %v703_v18 }
 0x116   : > { %v687_v32 = vsel %vm2283_vm6, 0, %v2282_v3  ;;  %v778_v39 = vadd.s32 1, %v2934_v19  ;;  %v775_v56 = vmul.u32 %v2878_v21, %v759_v31  ;;  %vm777_vm7 = vc.u32 %v2940_v47, %v2933_v10 }
 0x117   : > { %v592_v60 = vand.u32 2147483647, %v591_v5  ;;  %v688_v37 = vsub.s32 32, %v687_v32  ;;  %v692_v38 = vsub.s32 4294967266, %v687_v32  ;;  %v938_v2 = vadd.s32 1, %v2292_v15 }
 0x118   : > { %v689_v54 = vshll.u32 %v2898_v14, %v687_v32  ;;  %v779_v4 = vsel %vm777_vm7, %v778_v39, %v2934_v19  ;;  %v605_v53 = vadd.s32 3, %v601_v62  ;;  %v709_v12 = vadd.s32 3, %v705_v33 }
 0x119   : > { %v595_v41 = vmul.f32 %v594_v8, %v592_v60  ;;  %v690_v40 = vshrl.u32 %v672_v34, %v688_v37  ;;  %v693_v25 = vadd.s32 127, %v692_v38  ;;  %v780_v24 = vadd.s32 %v779_v4, %v775_v56 }
 0x11a   : > { %vm939_vm8 = vcmp.gt.s32.totalorder %v938_v2, 0  ;;  %v935_v14 = vand.u32 8388607, %v928_v44  ;;  %v2962_v18 = vmul.f32 %v2756_v59, %v438_v29  ;;  %v2964_v1 = vand.u32 3, %v605_v53 }
 0x11b   : > { %v596_v50 = vxor.u32 2147483648, %v595_v41  ;;  %v691_v22 = vor.u32 %v690_v40, %v689_v54  ;;  %v694_v6 = vshll.u32 %v693_v25, 23  ;;  %v940_v13 = vsel %vm939_vm8, %v938_v2, 0 }
 0x11c   : > { %v781_v3 = vadd.s32 536870912, %v780_v24  ;;  %v942_v51 = vand.u32 31, %v940_v13  ;;  %vm722_vm9 = vcmp.lt.s32.totalorder %v2782_v17, 0  ;;  %v2967_v8 = vand.u32 3, %v709_v12 }
 0x11d   : > { %v597_v21 = vsel %vm514_vm13, %v596_v50, %v595_v41  ;;  %v695_v5 = vor.u32 4788187, %v694_v6  ;;  %v698_v60 = vcvt.s32.f32 %v691_v22  ;;  %v936_v32 = vor.u32 8388608, %v935_v14 }
 0x11e   : > { %v600_v19 = vsel %vm2904_vm1, %v2768_v0, %v597_v21  ;;  %v782_v34 = vshrl.u32 %v781_v3, 30  ;;  %v943_v31 = vsub.s32 32, %v942_v51  ;;  %v2972_v37 = vadd.f32 %v2875_v48, %v2727_v9 }
 0x11f   : > { %2466 = vcosq.f32 %v600_v19  ;;  %v696_v15 = vand.u32 2147483647, %v695_v5  ;;  %v2975_v33 = vadd.s32 %v2933_v10, %v2940_v47  ;;  %vm611_vm10 = vcmp.eq.s32.totalorder %v2964_v1, 2 }
 0x120   : > { %2468 = vsinq.f32 %v600_v19  ;;  %v783_v62 = vshll.u32 %v782_v34, 30  ;;  %v946_v23 = vshrl.u32 %v2598_v55, %v943_v31  ;;  %v949_v39 = vshrl.u32 %v2599_v57, %v943_v31 }
 0x121   : > { %v699_v38 = vmul.f32 %v698_v60, %v696_v15  ;;  %v952_v41 = vshrl.u32 %v2600_v27, %v943_v31  ;;  %v2982_v2 = vshrl.u32 %v940_v13, 5  ;;  %v945_v54 = vshll.u32 %v2597_v52, %v942_v51 }
 0x122   : > { %v2980_v56 = vsub.s32 %v780_v24, %v783_v62  ;;  %v955_v40 = vshrl.u32 %v2601_v61, %v943_v31  ;;  %vm608_vm11 = vcmp.eq.s32.totalorder %v2964_v1, 0  ;;  %v806_v48 = vsub.s32 4, %v782_v34 }
 0x123   : > { %v700_v9 = vxor.u32 2147483648, %v699_v38  ;;  %v948_v10 = vshll.u32 %v2598_v55, %v942_v51  ;;  %v951_v47 = vshll.u32 %v2599_v57, %v942_v51  ;;  %vm607_vm12 = vcmp.lt.s32.totalorder %v2964_v1, 2 }
 0x124   : > { %v786_v25 = vsub.s32 0, %v2980_v56  ;;  %v947_v4 = vor.u32 %v946_v23, %v945_v54  ;;  %v954_v50 = vshll.u32 %v2600_v27, %v942_v51  ;;  %v2992_v53 = vshll.u32 %v936_v32, 8 }
 0x125   : > { %vm604_vm13 = vweird.f32 %v2768_v0  ;;  %v701_v24 = vsel %vm618_vm14, %v700_v9, %v699_v38  ;;  %v950_v29 = vor.u32 %v949_v39, %v948_v10  ;;  %v953_v22 = vor.u32 %v952_v41, %v951_v47 }
 0x126   : > { %v958_v6 = vshrl.u32 %v2602_v7, %v943_v31  ;;  %v704_v12 = vsel %vm2913_vm4, %v2770_v63, %v701_v24  ;;  %v2285_v13 = vmin.u32 %v786_v25, %v2980_v56  ;;  %v956_v21 = vor.u32 %v955_v40, %v954_v50 }
 0x127   : > { %v957_v3 = vshll.u32 %v2601_v61, %v942_v51  ;;  %2470 = vcosq.f32 %v704_v12  ;;  %v3006_v14 = vsel %vm722_vm9, %v806_v48, %v782_v34  ;;  %v944_v19 = vshrl.u32 %v2597_v52, %v943_v31 }
 0x128   : > { %vm960_vm14 = vcmp.lt.s32.totalorder %v2982_v2, 1  ;;  %2472 = vsinq.f32 %v704_v12  ;;  %vm3012_vm15 = vcmp.le.f32.partialorder %v720_v45, 0.7853982  ;;  %v788_v15 = vclz %v2285_v13 }
 0x129   : > { %v2467_v5 = vpop.eup %2466  ;;  %v959_v60 = vor.u32 %v958_v6, %v957_v3  ;;  %vm961_vm0 = vcmp.lt.s32.totalorder %v2982_v2, 2  ;;  %vm962_vm1 = vcmp.lt.s32.totalorder %v2982_v2, 3  ;;  %vm963_vm2 = vcmp.lt.s32.totalorder %v2982_v2, 4 }
 0x12a   : > { %v2469_v51 = vpop.eup %2468  ;;  %v612_v34 = vxor.u32 2147483648, %v2467_v5  ;;  %v968_v31 = vsel %vm960_vm14, %v947_v4, %v950_v29  ;;  %v2286_v45 = vadd.s32 4294967294, %v788_v15  ;;  %v965_v32 = vsel %vm963_vm2, %v953_v22, 2102212464 }
 0x12b   : > { %v609_v62 = vxor.u32 2147483648, %v2469_v51  ;;  %v969_v23 = vsel %vm963_vm2, %v956_v21, 920167782  ;;  %v964_v39 = vsel %vm960_vm14, %v944_v19, %v947_v4  ;;  %v972_v54 = vsel %vm960_vm14, %v950_v29, %v953_v22 }
 0x12c   : > { %v613_v38 = vsel %vm611_vm10, %v612_v34, %v2469_v51  ;;  %v970_v41 = vsel %vm962_vm1, %v953_v22, %v969_v23  ;;  %vm2287_vm3 = vcmp.lt.s32.totalorder %v2286_v45, 0  ;;  %v973_v48 = vsel %vm963_vm2, %v959_v60, 1326507024 }
 0x12d   : > { %v610_v40 = vsel %vm608_vm11, %v2467_v5, %v609_v62  ;;  %v971_v9 = vsel %vm961_vm0, %v968_v31, %v970_v41  ;;  %v791_v47 = vsel %vm2287_vm3, 0, %v2286_v45  ;;  %v966_v25 = vsel %vm962_vm1, %v950_v29, %v965_v32 }
 0x12e   : > { %v614_v10 = vsel %vm607_vm12, %v610_v40, %v613_v38  ;;  %v974_v4 = vsel %vm962_vm1, %v956_v21, %v973_v48  ;;  %vm708_vm4 = vweird.f32 %v2770_v63  ;;  %v792_v24 = vsub.s32 32, %v791_v47 }
 0x12f   : > { %v615_v50 = vsel %vm604_vm13, nan, %v614_v10  ;;  %v793_v22 = vshll.u32 %v2980_v56, %v791_v47  ;;  %v796_v6 = vsub.s32 4294967266, %v791_v47  ;;  %v975_v1 = vsel %vm961_vm0, %v972_v54, %v974_v4 }
 0x130   : > { %2176 = vst [vmem:[%s3045_s8] sm:$0xff] %v615_v50  ;;  %v3051_v29 = vmul.u32.u64.low %v2992_v53, %v971_v9  ;;  %v3052_v12 = vmul.u32.u64.high %v2992_v53, %v971_v9, %v3051_v29  ;;  %v827_v0 = vand.u32 2139095040, %v2972_v37  ;;  %v794_v13 = vshrl.u32 %v2975_v33, %v792_v24 }
 0x131   : > { %v797_v21 = vadd.s32 127, %v796_v6  ;;  %v3058_v56 = vmul.u32.u64.low %v2992_v53, %v975_v1  ;;  %v3059_v3 = vmul.u32.u64.high %v2992_v53, %v975_v1, %v3058_v56  ;;  %v2471_v19 = vpop.eup %2470  ;;  %vm711_vm5 = vcmp.lt.s32.totalorder %v2967_v8, 2 }
 0x132   : > { %vm715_vm6 = vcmp.eq.s32.totalorder %v2967_v8, 2  ;;  %v809_v5 = vsel %vm3012_vm15, 0, %v3006_v14  ;;  %v828_v15 = vshrl.u32 %v827_v0, 23  ;;  %v2473_v60 = vpop.eup %2472  ;;  %v716_v51 = vxor.u32 2147483648, %v2471_v19 }
 0x133   : > { %v795_v34 = vor.u32 %v794_v13, %v793_v22  ;;  %v798_v31 = vshll.u32 %v797_v21, 23  ;;  %v967_v33 = vsel %vm961_vm0, %v964_v39, %v966_v25  ;;  %v713_v62 = vxor.u32 2147483648, %v2473_v60 }
 0x134   : > { %v986_v45 = vadd.s32 1, %v3052_v12  ;;  %v824_v32 = vand.u32 2147483647, %v2972_v37  ;;  %v2288_v23 = vadd.s32 4294967169, %v828_v15  ;;  %vm712_vm7 = vcmp.eq.s32.totalorder %v2967_v8, 0 }
 0x135   : > { %v717_v38 = vsel %vm715_vm6, %v716_v51, %v2473_v60  ;;  %v799_v41 = vor.u32 4788187, %v798_v31  ;;  %v813_v14 = vadd.s32 3, %v809_v5  ;;  %v714_v54 = vsel %vm712_vm7, %v2471_v19, %v713_v62 }
 0x136   : > { %v983_v40 = vmul.u32 %v2992_v53, %v967_v33  ;;  %vm985_vm8 = vc.u32 %v3059_v3, %v3051_v29  ;;  %v834_v2 = vadd.s32 1, %v2288_v23  ;;  %v718_v39 = vsel %vm711_vm5, %v714_v54, %v717_v38 }
 0x137   : > { %v800_v9 = vand.u32 2147483647, %v799_v41  ;;  %v802_v48 = vcvt.s32.f32 %v795_v34  ;;  %v987_v10 = vsel %vm985_vm8, %v986_v45, %v3052_v12  ;;  %v719_v47 = vsel %vm708_vm4, nan, %v718_v39 }
 0x138   : > { %v988_v25 = vadd.s32 %v987_v10, %v983_v40  ;;  %v831_v4 = vand.u32 8388607, %v824_v32  ;;  %vm835_vm10 = vcmp.gt.s32.totalorder %v834_v2, 0  ;;  %2177 = vst [vmem:[%s3045_s8 + $0x8] sm:$0xff] %v719_v47  ;;  %v3084_v24 = vadd.f32 %v2962_v18, %v2734_v26 }
 0x139   : > { %v803_v53 = vmul.f32 %v802_v48, %v800_v9  ;;  %v836_v50 = vsel %vm835_vm10, %v834_v2, 0  ;;  %v3086_v1 = vand.u32 3, %v813_v14  ;;  %v984_v40 = vadd.s32 %v3051_v29, %v3059_v3 }
 0x13a   : > { %v989_v8 = vadd.s32 536870912, %v988_v25  ;;  %v838_v22 = vand.u32 31, %v836_v50  ;;  %v832_v63 = vor.u32 8388608, %v831_v4  ;;  %v3092_v21 = vshrl.u32 %v836_v50, 5 }
 0x13b   : > { %v804_v6 = vxor.u32 2147483648, %v803_v53  ;;  %v1139_v19 = vand.u32 2139095040, %v3084_v24  ;;  %v1136_v39 = vand.u32 2147483647, %v3084_v24  ;;  %vm816_vm11 = vcmp.eq.s32.totalorder %v3086_v1, 0 }
 0x13c   : > { %v3088_v12 = vshrl.u32 %v989_v8, 30  ;;  %v839_v0 = vsub.s32 32, %v838_v22  ;;  %v841_v56 = vshll.u32 %v2597_v52, %v838_v22  ;;  %v844_v5 = vshll.u32 %v2598_v55, %v838_v22 }
 0x13d   : > { %v805_v13 = vsel %vm722_vm9, %v804_v6, %v803_v53  ;;  %v847_v15 = vshll.u32 %v2599_v57, %v838_v22  ;;  %v850_v33 = vshll.u32 %v2600_v27, %v838_v22  ;;  %v853_v23 = vshll.u32 %v2601_v61, %v838_v22 }
 0x13e   : > { %v808_v26 = vsel %vm3012_vm15, %v2782_v17, %v805_v13  ;;  %v991_v18 = vshll.u32 %v3088_v12, 30  ;;  %v842_v60 = vshrl.u32 %v2598_v55, %v839_v0  ;;  %v845_v51 = vshrl.u32 %v2599_v57, %v839_v0 }
 0x13f   : > { %2474 = vcosq.f32 %v808_v26  ;;  %v848_v34 = vshrl.u32 %v2600_v27, %v839_v0  ;;  %v851_v30 = vshrl.u32 %v2601_v61, %v839_v0  ;;  %v854_v54 = vshrl.u32 %v2602_v7, %v839_v0 }
 0x140   : > { %2476 = vsinq.f32 %v808_v26  ;;  %v3105_v31 = vsub.s32 %v988_v25, %v991_v18  ;;  %v843_v62 = vor.u32 %v842_v60, %v841_v56  ;;  %v846_v45 = vor.u32 %v845_v51, %v844_v5 }
 0x141   : > { %v849_v41 = vor.u32 %v848_v34, %v847_v15  ;;  %v852_v14 = vor.u32 %v851_v30, %v850_v33  ;;  %vm819_vm9 = vcmp.eq.s32.totalorder %v3086_v1, 2  ;;  %v3115_v2 = vshll.u32 %v832_v63, 8 }
 0x142   : > { %v994_v38 = vsub.s32 0, %v3105_v31  ;;  %v1140_v9 = vshrl.u32 %v1139_v19, 23  ;;  %vm930_vm12 = vcmp.lt.s32.totalorder %v2862_v11, 0  ;;  %v855_v10 = vor.u32 %v854_v54, %v853_v23 }
 0x143   : > { %vm856_vm13 = vcmp.lt.s32.totalorder %v3092_v21, 1  ;;  %vm859_vm14 = vcmp.lt.s32.totalorder %v3092_v21, 4  ;;  %vm815_vm15 = vcmp.lt.s32.totalorder %v3086_v1, 2  ;;  %v1014_v29 = vsub.s32 4, %v3088_v12 }
 0x144   : > { %v2293_v48 = vmin.u32 %v994_v38, %v3105_v31  ;;  %v840_v3 = vshrl.u32 %v2597_v52, %v839_v0  ;;  %v864_v47 = vsel %vm856_vm13, %v843_v62, %v846_v45  ;;  %v865_v25 = vsel %vm859_vm14, %v852_v14, 920167782 }
 0x145   : > { %vm812_vm0 = vweird.f32 %v2782_v17  ;;  %vm858_vm1 = vcmp.lt.s32.totalorder %v3092_v21, 3  ;;  %v861_v53 = vsel %vm859_vm14, %v849_v41, 2102212464  ;;  %v868_v50 = vsel %vm856_vm13, %v846_v45, %v849_v41 }
 0x146   : > { %v996_v4 = vclz %v2293_v48  ;;  %vm857_vm2 = vcmp.lt.s32.totalorder %v3092_v21, 2  ;;  %v866_v8 = vsel %vm858_vm1, %v849_v41, %v865_v25  ;;  %v869_v22 = vsel %vm859_vm14, %v855_v10, 1326507024 }
 0x147   : > { %v2300_v6 = vadd.s32 4294967169, %v1140_v9  ;;  %v860_v0 = vsel %vm856_vm13, %v840_v3, %v843_v62  ;;  %v867_v13 = vsel %vm857_vm2, %v864_v47, %v866_v8  ;;  %v870_v56 = vsel %vm858_vm1, %v852_v14, %v869_v22 }
 0x148   : > { %v2294_v63 = vadd.s32 4294967294, %v996_v4  ;;  %v862_v26 = vsel %vm858_vm1, %v846_v45, %v861_v53  ;;  %v871_v18 = vsel %vm857_vm2, %v868_v50, %v870_v56  ;;  %v3150_v45 = vand.u32 8388607, %v1136_v39 }
 0x149   : > { %v2475_v19 = vpop.eup %2474  ;;  %v3140_v5 = vmul.u32.u64.low %v3115_v2, %v867_v13  ;;  %v3141_v15 = vmul.u32.u64.high %v3115_v2, %v867_v13, %v3140_v5  ;;  %v3145_v34 = vmul.u32.u64.low %v3115_v2, %v871_v18  ;;  %v3146_v33 = vmul.u32.u64.high %v3115_v2, %v871_v18, %v3145_v34 }
 0x14a   : > { %v2477_v60 = vpop.eup %2476  ;;  %v820_v51 = vxor.u32 2147483648, %v2475_v19  ;;  %vm2295_vm3 = vcmp.lt.s32.totalorder %v2294_v63, 0  ;;  %v1146_v23 = vadd.s32 1, %v2300_v6  ;;  %v863_v54 = vsel %vm857_vm2, %v860_v0, %v862_v26 }
 0x14b   : > { %v817_v30 = vxor.u32 2147483648, %v2477_v60  ;;  %v999_v62 = vsel %vm2295_vm3, 0, %v2294_v63  ;;  %v1015_v48 = vsel %vm930_vm12, %v1014_v29, %v3088_v12  ;;  %v882_v10 = vadd.s32 1, %v3141_v15  ;;  %v434_v12 = vpop.permute.xlu1 %433 }
 0x14c   : > { %v821_v38 = vsel %vm819_vm9, %v820_v51, %v2477_v60  ;;  %v1000_v41 = vsub.s32 32, %v999_v62  ;;  %v1004_v14 = vsub.s32 4294967266, %v999_v62  ;;  %vm1147_vm4 = vcmp.gt.s32.totalorder %v1146_v23, 0  ;;  %v446_v60 = vpop.permute.xlu0 %445 }
 0x14d   : > { %v818_v9 = vsel %vm816_vm11, %v2475_v19, %v817_v30  ;;  %v1001_v47 = vshll.u32 %v3105_v31, %v999_v62  ;;  %v879_v53 = vmul.u32 %v3115_v2, %v863_v54  ;;  %vm881_vm5 = vc.u32 %v3146_v33, %v3140_v5 }
 0x14e   : > { %v822_v3 = vsel %vm815_vm15, %v818_v9, %v821_v38  ;;  %v1002_v25 = vshrl.u32 %v984_v40, %v1000_v41  ;;  %v1005_v4 = vadd.s32 127, %v1004_v14  ;;  %v1148_v50 = vsel %vm1147_vm4, %v1146_v23, 0 }
 0x14f   : > { %v823_v21 = vsel %vm812_vm0, nan, %v822_v3  ;;  %v883_v1 = vsel %vm881_vm5, %v882_v10, %v3141_v15  ;;  %vm3174_vm6 = vcmp.le.f32.partialorder %v928_v44, 0.7853982  ;;  %v1150_v40 = vand.u32 31, %v1148_v50 }
 0x150   : > { %2178 = vst [vmem:[%s3045_s8 + $0x10] sm:$0xff] %v823_v21  ;;  %v1003_v29 = vor.u32 %v1002_v25, %v1001_v47  ;;  %v1006_v8 = vshll.u32 %v1005_v4, 23  ;;  %v884_v17 = vadd.s32 %v883_v1, %v879_v53  ;;  %v1017_v2 = vsel %vm3174_vm6, 0, %v1015_v48 }
 0x151   : > { %v1144_v6 = vor.u32 8388608, %v3150_v45  ;;  %v485_v63 = vmul.f32 %v2756_v59, %v434_v12  ;;  %v1149_v56 = vshrl.u32 %v1148_v50, 5  ;;  %v1151_v19 = vsub.s32 32, %v1150_v40 }
 0x152   : > { %v1007_v22 = vor.u32 4788187, %v1006_v8  ;;  %v1010_v0 = vcvt.s32.f32 %v1003_v29  ;;  %v885_v13 = vadd.s32 536870912, %v884_v17  ;;  %v1153_v44 = vshll.u32 %v2597_v52, %v1150_v40 }
 0x153   : > { %v1156_v18 = vshll.u32 %v2598_v55, %v1150_v40  ;;  %v1159_v15 = vshll.u32 %v2599_v57, %v1150_v40  ;;  %v1154_v34 = vshrl.u32 %v2598_v55, %v1151_v19  ;;  %v1157_v30 = vshrl.u32 %v2599_v57, %v1151_v19 }
 0x154   : > { %v1008_v26 = vand.u32 2147483647, %v1007_v22  ;;  %v886_v51 = vshrl.u32 %v885_v13, 30  ;;  %v1162_v62 = vshll.u32 %v2600_v27, %v1150_v40  ;;  %v1160_v23 = vshrl.u32 %v2600_v27, %v1151_v19 }
 0x155   : > { %v1163_v38 = vshrl.u32 %v2601_v61, %v1151_v19  ;;  %v1166_v41 = vshrl.u32 %v2602_v7, %v1151_v19  ;;  %v1155_v54 = vor.u32 %v1154_v34, %v1153_v44  ;;  %v1165_v9 = vshll.u32 %v2601_v61, %v1150_v40 }
 0x156   : > { %v1011_v45 = vmul.f32 %v1010_v0, %v1008_v26  ;;  %v887_v14 = vshll.u32 %v886_v51, 30  ;;  %v3193_v48 = vmul.f32 %v2756_v59, %v446_v60  ;;  %vm826_vm7 = vcmp.lt.s32.totalorder %v2972_v37, 0 }
 0x157   : > { %v1158_v3 = vor.u32 %v1157_v30, %v1156_v18  ;;  %v1161_v47 = vor.u32 %v1160_v23, %v1159_v15  ;;  %v1164_v25 = vor.u32 %v1163_v38, %v1162_v62  ;;  %v1021_v4 = vadd.s32 3, %v1017_v2 }
 0x158   : > { %v1012_v10 = vxor.u32 2147483648, %v1011_v45  ;;  %v3196_v21 = vsub.s32 %v884_v17, %v887_v14  ;;  %vm1168_vm8 = vcmp.lt.s32.totalorder %v1149_v56, 1  ;;  %v3199_v53 = vadd.f32 %v485_v63, %v2732_v16 }
 0x159   : > { %v1152_v12 = vshrl.u32 %v2597_v52, %v1151_v19  ;;  %v1167_v29 = vor.u32 %v1166_v41, %v1165_v9  ;;  %vm1169_vm10 = vcmp.lt.s32.totalorder %v1149_v56, 2  ;;  %vm1170_vm9 = vcmp.lt.s32.totalorder %v1149_v56, 3 }
 0x15a   : > { %v1013_v50 = vsel %vm930_vm12, %v1012_v10, %v1011_v45  ;;  %v890_v1 = vsub.s32 0, %v3196_v21  ;;  %vm1171_vm11 = vcmp.lt.s32.totalorder %v1149_v56, 4  ;;  %vm3210_vm13 = vcmp.le.f32.partialorder %v824_v32, 0.7853982 }
 0x15b   : > { %v1016_v8 = vsel %vm3174_vm6, %v2862_v11, %v1013_v50  ;;  %v1173_v17 = vsel %vm1171_vm11, %v1161_v47, 2102212464  ;;  %v1176_v40 = vsel %vm1168_vm8, %v1155_v54, %v1158_v3  ;;  %v1177_v22 = vsel %vm1171_vm11, %v1164_v25, 920167782 }
 0x15c   : > { %2478 = vcosq.f32 %v1016_v8  ;;  %v2289_v2 = vmin.u32 %v890_v1, %v3196_v21  ;;  %v910_v31 = vsub.s32 4, %v886_v51  ;;  %v1178_v63 = vsel %vm1170_vm9, %v1161_v47, %v1177_v22 }
 0x15d   : > { %2480 = vsinq.f32 %v1016_v8  ;;  %v1179_v0 = vsel %vm1169_vm10, %v1176_v40, %v1178_v63  ;;  %v1180_v13 = vsel %vm1168_vm8, %v1158_v3, %v1161_v47  ;;  %v1181_v19 = vsel %vm1171_vm11, %v1167_v29, 1326507024 }
 0x15e   : > { %v1184_v26 = vshll.u32 %v1144_v6, 8  ;;  %v1022_v32 = vand.u32 3, %v1021_v4  ;;  %v892_v44 = vclz %v2289_v2  ;;  %v1172_v18 = vsel %vm1168_vm8, %v1152_v12, %v1155_v54 }
 0x15f   : > { %v1174_v15 = vsel %vm1170_vm9, %v1158_v3, %v1173_v17  ;;  %v1182_v60 = vsel %vm1170_vm9, %v1164_v25, %v1181_v19  ;;  %v1035_v62 = vand.u32 2139095040, %v3199_v53  ;;  %v911_v23 = vsel %vm826_vm7, %v910_v31, %v886_v51 }
 0x160   : > { %v3222_v34 = vmul.u32.u64.low %v1184_v26, %v1179_v0  ;;  %v3223_v30 = vmul.u32.u64.high %v1184_v26, %v1179_v0, %v3222_v34  ;;  %v2290_v45 = vadd.s32 4294967294, %v892_v44  ;;  %v1183_v6 = vsel %vm1169_vm10, %v1180_v13, %v1182_v60 }
 0x161   : > { %v1032_v38 = vand.u32 2147483647, %v3199_v53  ;;  %v1175_v41 = vsel %vm1169_vm10, %v1172_v18, %v1174_v15  ;;  %v3232_v14 = vmul.u32.u64.low %v1184_v26, %v1183_v6  ;;  %v3233_v54 = vmul.u32.u64.high %v1184_v26, %v1183_v6, %v3232_v14 }
 0x162   : > { %v1036_v9 = vshrl.u32 %v1035_v62, 23  ;;  %vm1023_vm12 = vcmp.lt.s32.totalorder %v1022_v32, 2  ;;  %vm1024_vm14 = vcmp.eq.s32.totalorder %v1022_v32, 0  ;;  %vm1027_vm15 = vcmp.eq.s32.totalorder %v1022_v32, 2 }
 0x163   : > { %vm2291_vm0 = vcmp.lt.s32.totalorder %v2290_v45, 0  ;;  %v880_v10 = vadd.s32 %v3140_v5, %v3146_v33  ;;  %v1194_v51 = vadd.s32 1, %v3223_v30  ;;  %v913_v56 = vsel %vm3210_vm13, 0, %v911_v23 }
 0x164   : > { %v895_v3 = vsel %vm2291_vm0, 0, %v2290_v45  ;;  %v2296_v47 = vadd.s32 4294967169, %v1036_v9  ;;  %v1191_v50 = vmul.u32 %v1184_v26, %v1175_v41  ;;  %vm1193_vm1 = vc.u32 %v3233_v54, %v3222_v34 }
 0x165   : > { %v896_v25 = vsub.s32 32, %v895_v3  ;;  %v900_v4 = vsub.s32 4294967266, %v895_v3  ;;  %v897_v29 = vshll.u32 %v3196_v21, %v895_v3  ;;  %v1039_v8 = vand.u32 8388607, %v1032_v38 }
 0x166   : > { %v2479_v12 = vpop.eup %2478  ;;  %v1042_v5 = vadd.s32 1, %v2296_v47  ;;  %v1195_v22 = vsel %vm1193_vm1, %v1194_v51, %v3223_v30  ;;  %v917_v31 = vadd.s32 3, %v913_v56  ;;  %vm1020_vm3 = vweird.f32 %v2862_v11 }
 0x167   : > { %v2481_v33 = vpop.eup %2480  ;;  %v1028_v1 = vxor.u32 2147483648, %v2479_v12  ;;  %v898_v17 = vshrl.u32 %v880_v10, %v896_v25  ;;  %v901_v40 = vadd.s32 127, %v900_v4  ;;  %v1196_v63 = vadd.s32 %v1195_v22, %v1191_v50 }
 0x168   : > { %v1025_v2 = vxor.u32 2147483648, %v2481_v33  ;;  %vm1043_vm2 = vcmp.gt.s32.totalorder %v1042_v5, 0  ;;  %v1040_v18 = vor.u32 8388608, %v1039_v8  ;;  %v3251_v14 = vand.u32 3, %v917_v31 }
 0x169   : > { %v1029_v21 = vsel %vm1027_vm15, %v1028_v1, %v2481_v33  ;;  %v899_v0 = vor.u32 %v898_v17, %v897_v29  ;;  %v902_v13 = vshll.u32 %v901_v40, 23  ;;  %v1044_v19 = vsel %vm1043_vm2, %v1042_v5, 0 }
 0x16a   : > { %v1026_v26 = vsel %vm1024_vm14, %v2479_v12, %v1025_v2  ;;  %v1197_v44 = vadd.s32 536870912, %v1196_v63  ;;  %v1046_v15 = vand.u32 31, %v1044_v19  ;;  %v3255_v9 = vadd.f32 %v3193_v48, %v2738_v35 }
 0x16b   : > { %v1030_v60 = vsel %vm1023_vm12, %v1026_v26, %v1029_v21  ;;  %v903_v30 = vor.u32 4788187, %v902_v13  ;;  %v906_v41 = vcvt.s32.f32 %v899_v0  ;;  %v3259_v32 = vshll.u32 %v1040_v18, 8 }
 0x16c   : > { %v1031_v62 = vsel %vm1020_vm3, nan, %v1030_v60  ;;  %v1198_v45 = vshrl.u32 %v1197_v44, 30  ;;  %v1047_v23 = vsub.s32 32, %v1046_v15  ;;  %v1049_v3 = vshll.u32 %v2597_v52, %v1046_v15 }
 0x16d   : > { %2180 = vst [vmem:[%s3045_s8 + $0x20] sm:$0xff] %v1031_v62  ;;  %v904_v6 = vand.u32 2147483647, %v903_v30  ;;  %v1192_v56 = vadd.s32 %v3222_v34, %v3233_v54  ;;  %v1045_v35 = vshrl.u32 %v1044_v19, 5  ;;  %v1052_v48 = vshll.u32 %v2598_v55, %v1046_v15 }
 0x16e   : > { %v1199_v10 = vshll.u32 %v1198_v45, 30  ;;  %v1050_v11 = vshrl.u32 %v2598_v55, %v1047_v23  ;;  %v1053_v47 = vshrl.u32 %v2599_v57, %v1047_v23  ;;  %v1056_v25 = vshrl.u32 %v2600_v27, %v1047_v23 }
 0x16f   : > { %v907_v51 = vmul.f32 %v906_v41, %v904_v6  ;;  %v1059_v4 = vshrl.u32 %v2601_v61, %v1047_v23  ;;  %v1055_v8 = vshll.u32 %v2599_v57, %v1046_v15  ;;  %v1058_v5 = vshll.u32 %v2600_v27, %v1046_v15 }
 0x170   : > { %v3266_v50 = vsub.s32 %v1196_v63, %v1199_v10  ;;  %v1051_v29 = vor.u32 %v1050_v11, %v1049_v3  ;;  %vm1138_vm4 = vcmp.lt.s32.totalorder %v3084_v24, 0  ;;  %v1054_v1 = vor.u32 %v1053_v47, %v1052_v48 }
 0x171   : > { %v908_v12 = vxor.u32 2147483648, %v907_v51  ;;  %v1061_v17 = vshll.u32 %v2601_v61, %v1046_v15  ;;  %v1062_v34 = vshrl.u32 %v2602_v7, %v1047_v23  ;;  %v1057_v40 = vor.u32 %v1056_v25, %v1055_v8 }
 0x172   : > { %v1202_v33 = vsub.s32 0, %v3266_v50  ;;  %v1060_v22 = vor.u32 %v1059_v4, %v1058_v5  ;;  %v1347_v2 = vand.u32 2139095040, %v3255_v9  ;;  %v1222_v21 = vsub.s32 4, %v1198_v45 }
 0x173   : > { %v909_v54 = vsel %vm826_vm7, %v908_v12, %v907_v51  ;;  %v1063_v0 = vor.u32 %v1062_v34, %v1061_v17  ;;  %v1048_v13 = vshrl.u32 %v2597_v52, %v1047_v23  ;;  %vm1064_vm5 = vcmp.lt.s32.totalorder %v1045_v35, 1 }
 0x174   : > { %v912_v31 = vsel %vm3210_vm13, %v2972_v37, %v909_v54  ;;  %v2301_v63 = vmin.u32 %v1202_v33, %v3266_v50  ;;  %vm1065_vm6 = vcmp.lt.s32.totalorder %v1045_v35, 2  ;;  %vm1067_vm7 = vcmp.lt.s32.totalorder %v1045_v35, 4 }
 0x175   : > { %2482 = vcosq.f32 %v912_v31  ;;  %v1072_v26 = vsel %vm1064_vm5, %v1051_v29, %v1054_v1  ;;  %vm1066_vm8 = vcmp.lt.s32.totalorder %v1045_v35, 3  ;;  %v1069_v44 = vsel %vm1067_vm7, %v1057_v40, 2102212464 }
 0x176   : > { %2484 = vsinq.f32 %v912_v31  ;;  %v1204_v19 = vclz %v2301_v63  ;;  %v1073_v18 = vsel %vm1067_vm7, %v1060_v22, 920167782  ;;  %v1076_v15 = vsel %vm1064_vm5, %v1054_v1, %v1057_v40  ;;  %v442_v63 = vpop.permute.xlu1 %441 }
 0x177   : > { %v1068_v16 = vsel %vm1064_vm5, %v1048_v13, %v1051_v29  ;;  %v1074_v30 = vsel %vm1066_vm8, %v1057_v40, %v1073_v18  ;;  %v1077_v62 = vsel %vm1067_vm7, %v1063_v0, 1326507024  ;;  %v1070_v6 = vsel %vm1066_vm8, %v1054_v1, %v1069_v44 }
 0x178   : > { %v2302_v60 = vadd.s32 4294967294, %v1204_v19  ;;  %v1075_v41 = vsel %vm1065_vm6, %v1072_v26, %v1074_v30  ;;  %v1078_v10 = vsel %vm1066_vm8, %v1060_v22, %v1077_v62  ;;  %v1348_v3 = vshrl.u32 %v1347_v2, 23  ;;  %v454_v30 = vpop.permute.xlu0 %453 }
 0x179   : > { %v1079_v23 = vsel %vm1065_vm6, %v1076_v15, %v1078_v10  ;;  %v3286_v11 = vmul.u32.u64.low %v3259_v32, %v1075_v41  ;;  %v3287_v51 = vmul.u32.u64.high %v3259_v32, %v1075_v41, %v3286_v11  ;;  %v1223_v25 = vsel %vm1138_vm4, %v1222_v21, %v1198_v45 }
 0x17a   : > { %vm2303_vm10 = vcmp.lt.s32.totalorder %v2302_v60, 0  ;;  %v3293_v4 = vmul.u32.u64.low %v3259_v32, %v1079_v23  ;;  %v3294_v48 = vmul.u32.u64.high %v3259_v32, %v1079_v23, %v3293_v4  ;;  %v1071_v8 = vsel %vm1065_vm6, %v1068_v16, %v1070_v6 }
 0x17b   : > { %v1207_v47 = vsel %vm2303_vm10, 0, %v2302_v60  ;;  %v2308_v5 = vadd.s32 4294967169, %v1348_v3  ;;  %vm919_vm9 = vcmp.lt.s32.totalorder %v3251_v14, 2  ;;  %vm920_vm11 = vcmp.eq.s32.totalorder %v3251_v14, 0 }
 0x17c   : > { %v1208_v12 = vsub.s32 32, %v1207_v47  ;;  %v1212_v29 = vsub.s32 4294967266, %v1207_v47  ;;  %vm3301_vm13 = vcmp.le.f32.partialorder %v1136_v39, 0.7853982  ;;  %v1209_v45 = vshll.u32 %v3266_v50, %v1207_v47 }
 0x17d   : > { %v1090_v34 = vadd.s32 1, %v3287_v51  ;;  %v1354_v54 = vadd.s32 1, %v2308_v5  ;;  %vm923_vm12 = vcmp.eq.s32.totalorder %v3251_v14, 2  ;;  %v1225_v40 = vsel %vm3301_vm13, 0, %v1223_v25 }
 0x17e   : > { %v1210_v1 = vshrl.u32 %v1192_v56, %v1208_v12  ;;  %v1213_v17 = vadd.s32 127, %v1212_v29  ;;  %v1087_v22 = vmul.u32 %v3259_v32, %v1071_v8  ;;  %vm1089_vm14 = vc.u32 %v3294_v48, %v3286_v11 }
 0x17f   : > { %v2483_v35 = vpop.eup %2482  ;;  %v1091_v56 = vsel %vm1089_vm14, %v1090_v34, %v3287_v51  ;;  %v1344_v13 = vand.u32 2147483647, %v3255_v9  ;;  %vm1355_vm15 = vcmp.gt.s32.totalorder %v1354_v54, 0  ;;  %v1229_v44 = vadd.s32 3, %v1225_v40 }
 0x180   : > { %v2485_v39 = vpop.eup %2484  ;;  %v924_v2 = vxor.u32 2147483648, %v2483_v35  ;;  %v1211_v31 = vor.u32 %v1210_v1, %v1209_v45  ;;  %v1214_v50 = vshll.u32 %v1213_v17, 23  ;;  %v1092_v0 = vadd.s32 %v1091_v56, %v1087_v22 }
 0x181   : > { %v921_v21 = vxor.u32 2147483648, %v2485_v39  ;;  %v1356_v32 = vsel %vm1355_vm15, %v1354_v54, 0  ;;  %v487_v16 = vmul.f32 %v2756_v59, %v442_v63  ;;  %vm916_vm0 = vweird.f32 %v2972_v37 }
 0x182   : > { %v925_v19 = vsel %vm923_vm12, %v924_v2, %v2485_v39  ;;  %v1215_v26 = vor.u32 4788187, %v1214_v50  ;;  %v1093_v15 = vadd.s32 536870912, %v1092_v0  ;;  %v1358_v60 = vand.u32 31, %v1356_v32 }
 0x183   : > { %v922_v18 = vsel %vm920_vm11, %v2483_v35, %v921_v21  ;;  %v1218_v41 = vcvt.s32.f32 %v1211_v31  ;;  %v1351_v23 = vand.u32 8388607, %v1344_v13  ;;  %v3324_v25 = vand.u32 3, %v1229_v44 }
 0x184   : > { %v926_v62 = vsel %vm919_vm9, %v922_v18, %v925_v19  ;;  %v1216_v6 = vand.u32 2147483647, %v1215_v26  ;;  %v1094_v3 = vshrl.u32 %v1093_v15, 30  ;;  %v1359_v51 = vsub.s32 32, %v1358_v60 }
 0x185   : > { %v927_v10 = vsel %vm916_vm0, nan, %v926_v62  ;;  %v3327_v4 = vmul.f32 %v2756_v59, %v454_v30  ;;  %v1361_v37 = vshll.u32 %v2597_v52, %v1358_v60  ;;  %v3332_v29 = vadd.f32 %v487_v16, %v2736_v28 }
 0x186   : > { %2179 = vst [vmem:[%s3045_s8 + $0x18] sm:$0xff] %v927_v10  ;;  %v1219_v47 = vmul.f32 %v1218_v41, %v1216_v6  ;;  %v1095_v12 = vshll.u32 %v1094_v3, 30  ;;  %v1362_v14 = vshrl.u32 %v2598_v55, %v1359_v51  ;;  %v1365_v5 = vshrl.u32 %v2599_v57, %v1359_v51 }
 0x187   : > { %v1368_v45 = vshrl.u32 %v2600_v27, %v1359_v51  ;;  %v1371_v1 = vshrl.u32 %v2601_v61, %v1359_v51  ;;  %v1352_v34 = vor.u32 8388608, %v1351_v23  ;;  %v1357_v54 = vshrl.u32 %v1356_v32, 5 }
 0x188   : > { %v1220_v8 = vxor.u32 2147483648, %v1219_v47  ;;  %v3337_v17 = vsub.s32 %v1092_v0, %v1095_v12  ;;  %v1364_v35 = vshll.u32 %v2598_v55, %v1358_v60  ;;  %vm1034_vm1 = vcmp.lt.s32.totalorder %v3199_v53, 0 }
 0x189   : > { %v1363_v28 = vor.u32 %v1362_v14, %v1361_v37  ;;  %v1367_v22 = vshll.u32 %v2599_v57, %v1358_v60  ;;  %v1370_v39 = vshll.u32 %v2600_v27, %v1358_v60  ;;  %v1373_v56 = vshll.u32 %v2601_v61, %v1358_v60 }
 0x18a   : > { %v1221_v40 = vsel %vm1138_vm4, %v1220_v8, %v1219_v47  ;;  %v1098_v31 = vsub.s32 0, %v3337_v17  ;;  %v1366_v50 = vor.u32 %v1365_v5, %v1364_v35  ;;  %v1374_v0 = vshrl.u32 %v2602_v7, %v1359_v51 }
 0x18b   : > { %v1224_v2 = vsel %vm3301_vm13, %v3084_v24, %v1221_v40  ;;  %v1369_v63 = vor.u32 %v1368_v45, %v1367_v22  ;;  %v1372_v21 = vor.u32 %v1371_v1, %v1370_v39  ;;  %vm3353_vm2 = vcmp.le.f32.partialorder %v1032_v38, 0.7853982 }
 0x18c   : > { %2486 = vcosq.f32 %v1224_v2  ;;  %v2297_v33 = vmin.u32 %v1098_v31, %v3337_v17  ;;  %v1118_v26 = vsub.s32 4, %v1094_v3  ;;  %v1392_v44 = vshll.u32 %v1352_v34, 8 }
 0x18d   : > { %2488 = vsinq.f32 %v1224_v2  ;;  %v1360_v32 = vshrl.u32 %v2597_v52, %v1359_v51  ;;  %v1375_v18 = vor.u32 %v1374_v0, %v1373_v56  ;;  %vm1376_vm3 = vcmp.lt.s32.totalorder %v1357_v54, 1 }
 0x18e   : > { %vm1377_vm4 = vcmp.lt.s32.totalorder %v1357_v54, 2  ;;  %v1100_v15 = vclz %v2297_v33  ;;  %vm1378_vm5 = vcmp.lt.s32.totalorder %v1357_v54, 3  ;;  %vm1379_vm6 = vcmp.lt.s32.totalorder %v1357_v54, 4 }
 0x18f   : > { %v1384_v60 = vsel %vm1376_vm3, %v1363_v28, %v1366_v50  ;;  %v1381_v16 = vsel %vm1379_vm6, %v1369_v63, 2102212464  ;;  %v1385_v30 = vsel %vm1379_vm6, %v1372_v21, 920167782  ;;  %v1388_v62 = vsel %vm1376_vm3, %v1366_v50, %v1369_v63 }
 0x190   : > { %v1389_v38 = vsel %vm1379_vm6, %v1375_v18, 1326507024  ;;  %vm1232_vm7 = vcmp.eq.s32.totalorder %v3324_v25, 0  ;;  %v2298_v6 = vadd.s32 4294967294, %v1100_v15  ;;  %v1380_v41 = vsel %vm1376_vm3, %v1360_v32, %v1363_v28 }
 0x191   : > { %v1386_v10 = vsel %vm1378_vm5, %v1369_v63, %v1385_v30  ;;  %v1390_v23 = vsel %vm1378_vm5, %v1372_v21, %v1389_v38  ;;  %v1382_v47 = vsel %vm1378_vm5, %v1366_v50, %v1381_v16  ;;  %v1243_v37 = vand.u32 2139095040, %v3332_v29 }
 0x192   : > { %v1387_v51 = vsel %vm1377_vm4, %v1384_v60, %v1386_v10  ;;  %v1391_v12 = vsel %vm1377_vm4, %v1388_v62, %v1390_v23  ;;  %vm2299_vm8 = vcmp.lt.s32.totalorder %v2298_v6, 0  ;;  %v1119_v14 = vsel %vm1034_vm1, %v1118_v26, %v1094_v3 }
 0x193   : > { %v3365_v8 = vmul.u32.u64.low %v1392_v44, %v1391_v12  ;;  %v3366_v5 = vmul.u32.u64.high %v1392_v44, %v1391_v12, %v3365_v8  ;;  %v1103_v45 = vsel %vm2299_vm8, 0, %v2298_v6  ;;  %v1244_v35 = vshrl.u32 %v1243_v37, 23 }
 0x194   : > { %v3368_v1 = vmul.u32.u64.low %v1392_v44, %v1387_v51  ;;  %v3369_v34 = vmul.u32.u64.high %v1392_v44, %v1387_v51, %v3368_v1  ;;  %v1088_v40 = vadd.s32 %v3286_v11, %v3294_v48  ;;  %v1104_v28 = vsub.s32 32, %v1103_v45 }
 0x195   : > { %v1108_v22 = vsub.s32 4294967266, %v1103_v45  ;;  %v1383_v39 = vsel %vm1377_vm4, %v1380_v41, %v1382_v47  ;;  %vm1235_vm10 = vcmp.eq.s32.totalorder %v3324_v25, 2  ;;  %v1121_v3 = vsel %vm3353_vm2, 0, %v1119_v14 }
 0x196   : > { %v2487_v2 = vpop.eup %2486  ;;  %v1240_v31 = vand.u32 2147483647, %v3332_v29  ;;  %v2304_v50 = vadd.s32 4294967169, %v1244_v35  ;;  %v1105_v21 = vshll.u32 %v3337_v17, %v1103_v45  ;;  %v1106_v0 = vshrl.u32 %v1088_v40, %v1104_v28 }
 0x197   : > { %v2489_v56 = vpop.eup %2488  ;;  %v1236_v63 = vxor.u32 2147483648, %v2487_v2  ;;  %v1109_v33 = vadd.s32 127, %v1108_v22  ;;  %v1399_v48 = vmul.u32 %v1392_v44, %v1383_v39  ;;  %vm1401_vm9 = vc.u32 %v3366_v5, %v3368_v1 }
 0x198   : > { %v1233_v11 = vxor.u32 2147483648, %v2489_v56  ;;  %v1402_v54 = vadd.s32 1, %v3369_v34  ;;  %v1107_v32 = vor.u32 %v1106_v0, %v1105_v21  ;;  %v1250_v15 = vadd.s32 1, %v2304_v50 }
 0x199   : > { %v1237_v26 = vsel %vm1235_vm10, %v1236_v63, %v2489_v56  ;;  %v1110_v18 = vshll.u32 %v1109_v33, 23  ;;  %vm1228_vm11 = vweird.f32 %v3084_v24  ;;  %vm1231_vm13 = vcmp.lt.s32.totalorder %v3324_v25, 2 }
 0x19a   : > { %v1234_v17 = vsel %vm1232_vm7, %v2487_v2, %v1233_v11  ;;  %v1403_v60 = vsel %vm1401_vm9, %v1402_v54, %v3369_v34  ;;  %v3390_v62 = vadd.f32 %v3327_v4, %v2742_v42  ;;  %v1125_v6 = vadd.s32 3, %v1121_v3 }
 0x19b   : > { %v1238_v44 = vsel %vm1231_vm13, %v1234_v17, %v1237_v26  ;;  %v1111_v16 = vor.u32 4788187, %v1110_v18  ;;  %v1404_v30 = vadd.s32 %v1403_v60, %v1399_v48  ;;  %v1247_v41 = vand.u32 8388607, %v1240_v31 }
 0x19c   : > { %v1239_v38 = vsel %vm1228_vm11, nan, %v1238_v44  ;;  %vm1251_vm12 = vcmp.gt.s32.totalorder %v1250_v15, 0  ;;  %v1114_v10 = vcvt.s32.f32 %v1107_v32  ;;  %vm1346_vm14 = vcmp.lt.s32.totalorder %v3255_v9, 0 }
 0x19d   : > { %2182 = vst [vmem:[%s3045_s8 + $0x30] sm:$0xff] %v1239_v38  ;;  %v1112_v24 = vand.u32 2147483647, %v1111_v16  ;;  %v1405_v25 = vadd.s32 536870912, %v1404_v30  ;;  %v1252_v23 = vsel %vm1251_vm12, %v1250_v15, 0  ;;  %v3396_v37 = vand.u32 3, %v1125_v6 }
 0x19e   : > { %v1254_v47 = vand.u32 31, %v1252_v23  ;;  %v1248_v42 = vor.u32 8388608, %v1247_v41  ;;  %v1555_v14 = vand.u32 2139095040, %v3390_v62  ;;  %v1253_v34 = vshrl.u32 %v1252_v23, 5 }
 0x19f   : > { %v1115_v51 = vmul.f32 %v1114_v10, %v1112_v24  ;;  %v1406_v12 = vshrl.u32 %v1405_v25, 30  ;;  %vm3419_vm15 = vcmp.le.f32.partialorder %v1344_v13, 0.7853982  ;;  %v1552_v60 = vand.u32 2147483647, %v3390_v62 }
 0x1a0   : > { %v1255_v4 = vsub.s32 32, %v1254_v47  ;;  %v1257_v35 = vshll.u32 %v2597_v52, %v1254_v47  ;;  %v1260_v28 = vshll.u32 %v2598_v55, %v1254_v47  ;;  %v1263_v50 = vshll.u32 %v2599_v57, %v1254_v47 }
 0x1a1   : > { %v1116_v8 = vxor.u32 2147483648, %v1115_v51  ;;  %v1407_v45 = vshll.u32 %v1406_v12, 30  ;;  %v1430_v21 = vsub.s32 4, %v1406_v12  ;;  %v1266_v33 = vshll.u32 %v2600_v27, %v1254_v47 }
 0x1a2   : > { %v1258_v40 = vshrl.u32 %v2598_v55, %v1255_v4  ;;  %v1261_v22 = vshrl.u32 %v2599_v57, %v1255_v4  ;;  %v1264_v39 = vshrl.u32 %v2600_v27, %v1255_v4  ;;  %v1267_v56 = vshrl.u32 %v2601_v61, %v1255_v4 }
 0x1a3   : > { %v1117_v2 = vsel %vm1034_vm1, %v1116_v8, %v1115_v51  ;;  %v3406_v3 = vsub.s32 %v1404_v30, %v1407_v45  ;;  %v1269_v32 = vshll.u32 %v2601_v61, %v1254_v47  ;;  %v1270_v18 = vshrl.u32 %v2602_v7, %v1255_v4 }
 0x1a4   : > { %v1120_v63 = vsel %vm3353_vm2, %v3199_v53, %v1117_v2  ;;  %v1259_v0 = vor.u32 %v1258_v40, %v1257_v35  ;;  %v1262_v48 = vor.u32 %v1261_v22, %v1260_v28  ;;  %v1265_v54 = vor.u32 %v1264_v39, %v1263_v50 }
 0x1a5   : > { %2490 = vcosq.f32 %v1120_v63  ;;  %v1410_v11 = vsub.s32 0, %v3406_v3  ;;  %v1268_v26 = vor.u32 %v1267_v56, %v1266_v33  ;;  %v1288_v17 = vshll.u32 %v1248_v42, 8 }
 0x1a6   : > { %2492 = vsinq.f32 %v1120_v63  ;;  %v1556_v44 = vshrl.u32 %v1555_v14, 23  ;;  %v1431_v16 = vsel %vm1346_vm14, %v1430_v21, %v1406_v12  ;;  %v1256_v30 = vshrl.u32 %v2597_v52, %v1255_v4 }
 0x1a7   : > { %v2309_v15 = vmin.u32 %v1410_v11, %v3406_v3  ;;  %v1271_v38 = vor.u32 %v1270_v18, %v1269_v32  ;;  %vm1272_vm0 = vcmp.lt.s32.totalorder %v1253_v34, 1  ;;  %vm1131_vm1 = vcmp.eq.s32.totalorder %v3396_v37, 2 }
 0x1a8   : > { %vm1273_vm2 = vcmp.lt.s32.totalorder %v1253_v34, 2  ;;  %vm1274_vm3 = vcmp.lt.s32.totalorder %v1253_v34, 3  ;;  %vm1275_vm4 = vcmp.lt.s32.totalorder %v1253_v34, 4  ;;  %vm1128_vm5 = vcmp.eq.s32.totalorder %v3396_v37, 0 }
 0x1a9   : > { %v1412_v6 = vclz %v2309_v15  ;;  %v1277_v13 = vsel %vm1275_vm4, %v1265_v54, 2102212464  ;;  %v1280_v41 = vsel %vm1272_vm0, %v1259_v0, %v1262_v48  ;;  %v1281_v24 = vsel %vm1275_vm4, %v1268_v26, 920167782 }
 0x1aa   : > { %v1284_v10 = vsel %vm1272_vm0, %v1262_v48, %v1265_v54  ;;  %vm1127_vm6 = vcmp.lt.s32.totalorder %v3396_v37, 2  ;;  %v1276_v23 = vsel %vm1272_vm0, %v1256_v30, %v1259_v0  ;;  %v1282_v47 = vsel %vm1274_vm3, %v1265_v54, %v1281_v24 }
 0x1ab   : > { %v2310_v25 = vadd.s32 4294967294, %v1412_v6  ;;  %v1285_v51 = vsel %vm1275_vm4, %v1271_v38, 1326507024  ;;  %vm1124_vm7 = vweird.f32 %v3199_v53  ;;  %v1278_v12 = vsel %vm1274_vm3, %v1262_v48, %v1277_v13 }
 0x1ac   : > { %v1283_v42 = vsel %vm1273_vm2, %v1280_v41, %v1282_v47  ;;  %v1286_v4 = vsel %vm1274_vm3, %v1268_v26, %v1285_v51  ;;  %v2316_v14 = vadd.s32 4294967169, %v1556_v44  ;;  %v1400_v40 = vadd.s32 %v3368_v1, %v3366_v5  ;;  %v450_v41 = vpop.permute.xlu1 %449 }
 0x1ad   : > { %vm2311_vm8 = vcmp.lt.s32.totalorder %v2310_v25, 0  ;;  %v1287_v8 = vsel %vm1273_vm2, %v1284_v10, %v1286_v4  ;;  %v3434_v45 = vmul.u32.u64.low %v1288_v17, %v1283_v42  ;;  %v3435_v35 = vmul.u32.u64.high %v1288_v17, %v1283_v42, %v3434_v45 }
 0x1ae   : > { %v1415_v28 = vsel %vm2311_vm8, 0, %v2310_v25  ;;  %v3440_v22 = vmul.u32.u64.low %v1288_v17, %v1287_v8  ;;  %v3441_v39 = vmul.u32.u64.high %v1288_v17, %v1287_v8, %v3440_v22  ;;  %v1279_v63 = vsel %vm1273_vm2, %v1276_v23, %v1278_v12  ;;  %v462_v25 = vpop.permute.xlu0 %461 }
 0x1af   : > { %v2491_v2 = vpop.eup %2490  ;;  %v1416_v50 = vsub.s32 32, %v1415_v28  ;;  %v1420_v56 = vsub.s32 4294967266, %v1415_v28  ;;  %v1562_v21 = vadd.s32 1, %v2316_v14  ;;  %v1417_v11 = vshll.u32 %v3406_v3, %v1415_v28 }
 0x1b0   : > { %v2493_v0 = vpop.eup %2492  ;;  %v1132_v33 = vxor.u32 2147483648, %v2491_v2  ;;  %v1433_v48 = vsel %vm3419_vm15, 0, %v1431_v16  ;;  %v1559_v5 = vand.u32 8388607, %v1552_v60  ;;  %v1298_v32 = vadd.s32 1, %v3435_v35 }
 0x1b1   : > { %v1129_v1 = vxor.u32 2147483648, %v2493_v0  ;;  %v1418_v54 = vshrl.u32 %v1400_v40, %v1416_v50  ;;  %v1421_v26 = vadd.s32 127, %v1420_v56  ;;  %v1295_v18 = vmul.u32 %v1288_v17, %v1279_v63 }
 0x1b2   : > { %v1133_v34 = vsel %vm1131_vm1, %v1132_v33, %v2493_v0  ;;  %vm1297_vm10 = vc.u32 %v3441_v39, %v3434_v45  ;;  %vm1563_vm9 = vcmp.gt.s32.totalorder %v1562_v21, 0  ;;  %v1437_v38 = vadd.s32 3, %v1433_v48 }
 0x1b3   : > { %v1130_v3 = vsel %vm1128_vm5, %v2491_v2, %v1129_v1  ;;  %v1419_v15 = vor.u32 %v1418_v54, %v1417_v11  ;;  %v1422_v44 = vshll.u32 %v1421_v26, 23  ;;  %v1299_v16 = vsel %vm1297_vm10, %v1298_v32, %v3435_v35 }
 0x1b4   : > { %v1134_v30 = vsel %vm1127_vm6, %v1130_v3, %v1133_v34  ;;  %v1300_v6 = vadd.s32 %v1299_v16, %v1295_v18  ;;  %v1564_v13 = vsel %vm1563_vm9, %v1562_v21, 0  ;;  %v1560_v10 = vor.u32 8388608, %v1559_v5 }
 0x1b5   : > { %v1135_v17 = vsel %vm1124_vm7, nan, %v1134_v30  ;;  %v1423_v24 = vor.u32 4788187, %v1422_v44  ;;  %v1566_v47 = vand.u32 31, %v1564_v13  ;;  %v1426_v12 = vcvt.s32.f32 %v1419_v15 }
 0x1b6   : > { %2181 = vst [vmem:[%s3045_s8 + $0x28] sm:$0xff] %v1135_v17  ;;  %v1301_v23 = vadd.s32 536870912, %v1300_v6  ;;  %v489_v42 = vmul.f32 %v2756_v59, %v450_v41  ;;  %v3463_v4 = vand.u32 3, %v1437_v38  ;;  %v3466_v8 = vmul.f32 %v2756_v59, %v462_v25 }
 0x1b7   : > { %v1424_v51 = vand.u32 2147483647, %v1423_v24  ;;  %v1567_v14 = vsub.s32 32, %v1566_v47  ;;  %vm1242_vm11 = vcmp.lt.s32.totalorder %v3332_v29, 0  ;;  %v3469_v53 = vshrl.u32 %v1564_v13, 5 }
 0x1b8   : > { %v1302_v37 = vshrl.u32 %v1301_v23, 30  ;;  %v1569_v40 = vshll.u32 %v2597_v52, %v1566_v47  ;;  %v3472_v28 = vshll.u32 %v1560_v10, 8  ;;  %v1572_v50 = vshll.u32 %v2598_v55, %v1566_v47 }
 0x1b9   : > { %v1427_v35 = vmul.f32 %v1426_v12, %v1424_v51  ;;  %v1570_v2 = vshrl.u32 %v2598_v55, %v1567_v14  ;;  %v1575_v56 = vshll.u32 %v2599_v57, %v1566_v47  ;;  %v1573_v21 = vshrl.u32 %v2599_v57, %v1567_v14 }
 0x1ba   : > { %v1303_v22 = vshll.u32 %v1302_v37, 30  ;;  %v1576_v0 = vshrl.u32 %v2600_v27, %v1567_v14  ;;  %v1579_v33 = vshrl.u32 %v2601_v61, %v1567_v14  ;;  %v1578_v48 = vshll.u32 %v2600_v27, %v1566_v47 }
 0x1bb   : > { %v1428_v63 = vxor.u32 2147483648, %v1427_v35  ;;  %v1581_v5 = vshll.u32 %v2601_v61, %v1566_v47  ;;  %v1582_v1 = vshrl.u32 %v2602_v7, %v1567_v14  ;;  %vm3489_vm13 = vcmp.le.f32.partialorder %v1240_v31, 0.7853982 }
 0x1bc   : > { %v3480_v11 = vsub.s32 %v1300_v6, %v1303_v22  ;;  %v1571_v32 = vor.u32 %v1570_v2, %v1569_v40  ;;  %v1574_v34 = vor.u32 %v1573_v21, %v1572_v50  ;;  %v1577_v18 = vor.u32 %v1576_v0, %v1575_v56 }
 0x1bd   : > { %v1429_v54 = vsel %vm1346_vm14, %v1428_v63, %v1427_v35  ;;  %v1326_v44 = vsub.s32 4, %v1302_v37  ;;  %v1580_v16 = vor.u32 %v1579_v33, %v1578_v48  ;;  %v1583_v30 = vor.u32 %v1582_v1, %v1581_v5 }
 0x1be   : > { %v1432_v3 = vsel %vm3419_vm15, %v3255_v9, %v1429_v54  ;;  %v1306_v15 = vsub.s32 0, %v3480_v11  ;;  %vm1584_vm12 = vcmp.lt.s32.totalorder %v3469_v53, 1  ;;  %v3499_v31 = vadd.f32 %v489_v42, %v2740_v36 }
 0x1bf   : > { %2494 = vcosq.f32 %v1432_v3  ;;  %vm1585_vm14 = vcmp.lt.s32.totalorder %v3469_v53, 2  ;;  %vm1587_vm0 = vcmp.lt.s32.totalorder %v3469_v53, 4  ;;  %v1568_v19 = vshrl.u32 %v2597_v52, %v1567_v14 }
 0x1c0   : > { %2496 = vsinq.f32 %v1432_v3  ;;  %v2305_v38 = vmin.u32 %v1306_v15, %v3480_v11  ;;  %v1589_v6 = vsel %vm1587_vm0, %v1577_v18, 2102212464  ;;  %v1592_v13 = vsel %vm1584_vm12, %v1571_v32, %v1574_v34 }
 0x1c1   : > { %v1593_v41 = vsel %vm1587_vm0, %v1580_v16, 920167782  ;;  %v1327_v24 = vsel %vm1242_vm11, %v1326_v44, %v1302_v37  ;;  %vm1586_vm15 = vcmp.lt.s32.totalorder %v3469_v53, 3  ;;  %v1596_v36 = vsel %vm1584_vm12, %v1574_v34, %v1577_v18 }
 0x1c2   : > { %v1308_v17 = vclz %v2305_v38  ;;  %v1588_v10 = vsel %vm1584_vm12, %v1568_v19, %v1571_v32  ;;  %v1594_v25 = vsel %vm1586_vm15, %v1577_v18, %v1593_v41  ;;  %v1597_v23 = vsel %vm1587_vm0, %v1583_v30, 1326507024 }
 0x1c3   : > { %v1451_v47 = vand.u32 2139095040, %v3499_v31  ;;  %vm1440_vm1 = vcmp.eq.s32.totalorder %v3463_v4, 0  ;;  %v1590_v12 = vsel %vm1586_vm15, %v1574_v34, %v1589_v6  ;;  %v1595_v42 = vsel %vm1585_vm14, %v1592_v13, %v1594_v25 }
 0x1c4   : > { %v2306_v51 = vadd.s32 4294967294, %v1308_v17  ;;  %v1598_v14 = vsel %vm1586_vm15, %v1580_v16, %v1597_v23  ;;  %vm1439_vm2 = vcmp.lt.s32.totalorder %v3463_v4, 2  ;;  %v1329_v2 = vsel %vm3489_vm13, 0, %v1327_v24 }
 0x1c5   : > { %v1599_v37 = vsel %vm1585_vm14, %v1596_v36, %v1598_v14  ;;  %v3516_v35 = vmul.u32.u64.low %v3472_v28, %v1595_v42  ;;  %v3517_v40 = vmul.u32.u64.high %v3472_v28, %v1595_v42, %v3516_v35  ;;  %v1452_v22 = vshrl.u32 %v1451_v47, 23 }
 0x1c6   : > { %vm2307_vm3 = vcmp.lt.s32.totalorder %v2306_v51, 0  ;;  %v3523_v50 = vmul.u32.u64.low %v3472_v28, %v1599_v37  ;;  %v3524_v56 = vmul.u32.u64.high %v3472_v28, %v1599_v37, %v3523_v50  ;;  %vm1443_vm4 = vcmp.eq.s32.totalorder %v3463_v4, 2 }
 0x1c7   : > { %v1311_v63 = vsel %vm2307_vm3, 0, %v2306_v51  ;;  %v2312_v21 = vadd.s32 4294967169, %v1452_v22  ;;  %v3529_v0 = vadd.f32 %v3466_v8, %v2747_v49  ;;  %v1296_v33 = vadd.s32 %v3434_v45, %v3441_v39 }
 0x1c8   : > { %v1312_v48 = vsub.s32 32, %v1311_v63  ;;  %v1316_v5 = vsub.s32 4294967266, %v1311_v63  ;;  %v1591_v1 = vsel %vm1585_vm14, %v1588_v10, %v1590_v12  ;;  %v1333_v32 = vadd.s32 3, %v1329_v2 }
 0x1c9   : > { %v2495_v54 = vpop.eup %2494  ;;  %v1610_v34 = vadd.s32 1, %v3517_v40  ;;  %v1448_v18 = vand.u32 2147483647, %v3499_v31  ;;  %v1458_v3 = vadd.s32 1, %v2312_v21  ;;  %v1313_v49 = vshll.u32 %v3480_v11, %v1311_v63 }
 0x1ca   : > { %v2497_v15 = vpop.eup %2496  ;;  %v1444_v44 = vxor.u32 2147483648, %v2495_v54  ;;  %v1314_v8 = vshrl.u32 %v1296_v33, %v1312_v48  ;;  %v1317_v16 = vadd.s32 127, %v1316_v5  ;;  %v1607_v45 = vmul.u32 %v3472_v28, %v1591_v1 }
 0x1cb   : > { %v1441_v30 = vxor.u32 2147483648, %v2497_v15  ;;  %vm1609_vm5 = vc.u32 %v3524_v56, %v3516_v35  ;;  %vm1459_vm6 = vcmp.gt.s32.totalorder %v1458_v3, 0  ;;  %v1455_v13 = vand.u32 8388607, %v1448_v18 }
 0x1cc   : > { %v1445_v39 = vsel %vm1443_vm4, %v1444_v44, %v2497_v15  ;;  %v1315_v53 = vor.u32 %v1314_v8, %v1313_v49  ;;  %v1318_v38 = vshll.u32 %v1317_v16, 23  ;;  %v1611_v19 = vsel %vm1609_vm5, %v1610_v34, %v3517_v40 }
 0x1cd   : > { %v1442_v11 = vsel %vm1440_vm1, %v2495_v54, %v1441_v30  ;;  %v1612_v6 = vadd.s32 %v1611_v19, %v1607_v45  ;;  %v1460_v28 = vsel %vm1459_vm6, %v1458_v3, 0  ;;  %vm1436_vm7 = vweird.f32 %v3255_v9 }
 0x1ce   : > { %v1446_v41 = vsel %vm1439_vm2, %v1442_v11, %v1445_v39  ;;  %v1319_v17 = vor.u32 4788187, %v1318_v38  ;;  %v1763_v24 = vand.u32 2139095040, %v3529_v0  ;;  %v1462_v25 = vand.u32 31, %v1460_v28 }
 0x1cf   : > { %v1447_v36 = vsel %vm1436_vm7, nan, %v1446_v41  ;;  %v1613_v10 = vadd.s32 536870912, %v1612_v6  ;;  %v1322_v47 = vcvt.s32.f32 %v1315_v53  ;;  %v3553_v51 = vand.u32 3, %v1333_v32 }
 0x1d0   : > { %2184 = vst [vmem:[%s3045_s8 + $0x40] sm:$0xff] %v1447_v36  ;;  %v1320_v23 = vand.u32 2147483647, %v1319_v17  ;;  %v1456_v42 = vor.u32 8388608, %v1455_v13  ;;  %v1463_v14 = vsub.s32 32, %v1462_v25  ;;  %v1461_v40 = vshrl.u32 %v1460_v28, 5 }
 0x1d1   : > { %v1614_v12 = vshrl.u32 %v1613_v10, 30  ;;  %v1465_v9 = vshll.u32 %v2597_v52, %v1462_v25  ;;  %v1764_v4 = vshrl.u32 %v1763_v24, 23  ;;  %v1468_v50 = vshll.u32 %v2598_v55, %v1462_v25 }
 0x1d2   : > { %v1323_v37 = vmul.f32 %v1322_v47, %v1320_v23  ;;  %v1466_v2 = vshrl.u32 %v2598_v55, %v1463_v14  ;;  %v1471_v63 = vshll.u32 %v2599_v57, %v1462_v25  ;;  %vm1554_vm8 = vcmp.lt.s32.totalorder %v3390_v62, 0 }
 0x1d3   : > { %v1615_v22 = vshll.u32 %v1614_v12, 30  ;;  %v1469_v33 = vshrl.u32 %v2599_v57, %v1463_v14  ;;  %v1472_v48 = vshrl.u32 %v2600_v27, %v1463_v14  ;;  %v1475_v5 = vshrl.u32 %v2601_v61, %v1463_v14 }
 0x1d4   : > { %v1324_v21 = vxor.u32 2147483648, %v1323_v37  ;;  %v1474_v54 = vshll.u32 %v2600_v27, %v1462_v25  ;;  %v1477_v32 = vshll.u32 %v2601_v61, %v1462_v25  ;;  %v1478_v34 = vshrl.u32 %v2602_v7, %v1463_v14 }
 0x1d5   : > { %v3563_v1 = vsub.s32 %v1612_v6, %v1615_v22  ;;  %v1467_v15 = vor.u32 %v1466_v2, %v1465_v9  ;;  %v1470_v44 = vor.u32 %v1469_v33, %v1468_v50  ;;  %v1473_v49 = vor.u32 %v1472_v48, %v1471_v63 }
 0x1d6   : > { %v1325_v3 = vsel %vm1242_vm11, %v1324_v21, %v1323_v37  ;;  %v1476_v30 = vor.u32 %v1475_v5, %v1474_v54  ;;  %vm1480_vm10 = vcmp.lt.s32.totalorder %v1461_v40, 1  ;;  %v1638_v45 = vsub.s32 4, %v1614_v12 }
 0x1d7   : > { %v1328_v8 = vsel %vm3489_vm13, %v3332_v29, %v1325_v3  ;;  %v1618_v16 = vsub.s32 0, %v3563_v1  ;;  %v1479_v39 = vor.u32 %v1478_v34, %v1477_v32  ;;  %vm1483_vm9 = vcmp.lt.s32.totalorder %v1461_v40, 4 }
 0x1d8   : > { %2498 = vcosq.f32 %v1328_v8  ;;  %vm3576_vm12 = vcmp.le.f32.partialorder %v1552_v60, 0.7853982  ;;  %v1464_v26 = vshrl.u32 %v2597_v52, %v1463_v14  ;;  %v1485_v19 = vsel %vm1483_vm9, %v1473_v49, 2102212464 }
 0x1d9   : > { %2500 = vsinq.f32 %v1328_v8  ;;  %v2317_v38 = vmin.u32 %v1618_v16, %v3563_v1  ;;  %vm1482_vm11 = vcmp.lt.s32.totalorder %v1461_v40, 3  ;;  %v1488_v11 = vsel %vm1480_vm10, %v1467_v15, %v1470_v44 }
 0x1da   : > { %v1489_v6 = vsel %vm1483_vm9, %v1476_v30, 920167782  ;;  %v1496_v13 = vshll.u32 %v1456_v42, 8  ;;  %v1484_v41 = vsel %vm1480_vm10, %v1464_v26, %v1467_v15  ;;  %v1486_v17 = vsel %vm1482_vm11, %v1470_v44, %v1485_v19 }
 0x1db   : > { %v1620_v28 = vclz %v2317_v38  ;;  %v1492_v60 = vsel %vm1480_vm10, %v1470_v44, %v1473_v49  ;;  %vm1481_vm13 = vcmp.lt.s32.totalorder %v1461_v40, 2  ;;  %v1490_v24 = vsel %vm1482_vm11, %v1473_v49, %v1489_v6 }
 0x1dc   : > { %v1493_v36 = vsel %vm1483_vm9, %v1479_v39, 1326507024  ;;  %v2324_v10 = vadd.s32 4294967169, %v1764_v4  ;;  %v1639_v23 = vsel %vm1554_vm8, %v1638_v45, %v1614_v12  ;;  %v1491_v47 = vsel %vm1481_vm13, %v1488_v11, %v1490_v24  ;;  %v458_v11 = vpop.permute.xlu1 %457 }
 0x1dd   : > { %v2318_v25 = vadd.s32 4294967294, %v1620_v28  ;;  %v1494_v14 = vsel %vm1482_vm11, %v1476_v30, %v1493_v36  ;;  %v1487_v37 = vsel %vm1481_vm13, %v1484_v41, %v1486_v17  ;;  %vm1336_vm0 = vcmp.eq.s32.totalorder %v3553_v51, 0 }
 0x1de   : > { %v1495_v9 = vsel %vm1481_vm13, %v1492_v60, %v1494_v14  ;;  %v3590_v42 = vmul.u32.u64.low %v1496_v13, %v1491_v47  ;;  %v3591_v22 = vmul.u32.u64.high %v1496_v13, %v1491_v47, %v3590_v42  ;;  %v1770_v63 = vadd.s32 1, %v2324_v10 }
 0x1df   : > { %vm2319_vm14 = vcmp.lt.s32.totalorder %v2318_v25, 0  ;;  %v3594_v2 = vmul.u32.u64.low %v1496_v13, %v1495_v9  ;;  %v3595_v50 = vmul.u32.u64.high %v1496_v13, %v1495_v9, %v3594_v2  ;;  %vm1339_vm15 = vcmp.eq.s32.totalorder %v3553_v51, 2 }
 0x1e0   : > { %v1623_v40 = vsel %vm2319_vm14, 0, %v2318_v25  ;;  %v1760_v12 = vand.u32 2147483647, %v3529_v0  ;;  %v1608_v4 = vadd.s32 %v3516_v35, %v3524_v56  ;;  %vm1771_vm1 = vcmp.gt.s32.totalorder %v1770_v63, 0 }
 0x1e1   : > { %v1624_v21 = vsub.s32 32, %v1623_v40  ;;  %v1628_v33 = vsub.s32 4294967266, %v1623_v40  ;;  %v1641_v5 = vsel %vm3576_vm12, 0, %v1639_v23  ;;  %v1503_v54 = vmul.u32 %v1496_v13, %v1487_v37 }
 0x1e2   : > { %v2499_v48 = vpop.eup %2498  ;;  %v1506_v32 = vadd.s32 1, %v3591_v22  ;;  %v1772_v34 = vsel %vm1771_vm1, %v1770_v63, 0  ;;  %v1625_v44 = vshll.u32 %v3563_v1, %v1623_v40  ;;  %vm1505_vm2 = vc.u32 %v3595_v50, %v3590_v42 }
 0x1e3   : > { %v2501_v3 = vpop.eup %2500  ;;  %v1340_v15 = vxor.u32 2147483648, %v2499_v48  ;;  %v1626_v49 = vshrl.u32 %v1608_v4, %v1624_v21  ;;  %v1629_v8 = vadd.s32 127, %v1628_v33  ;;  %v1767_v35 = vand.u32 8388607, %v1760_v12 }
 0x1e4   : > { %v1337_v16 = vxor.u32 2147483648, %v2501_v3  ;;  %v1774_v56 = vand.u32 31, %v1772_v34  ;;  %v1507_v38 = vsel %vm1505_vm2, %v1506_v32, %v3591_v22  ;;  %vm1335_vm3 = vcmp.lt.s32.totalorder %v3553_v51, 2 }
 0x1e5   : > { %v1341_v30 = vsel %vm1339_vm15, %v1340_v15, %v2501_v3  ;;  %v1627_v45 = vor.u32 %v1626_v49, %v1625_v44  ;;  %v1630_v39 = vshll.u32 %v1629_v8, 23  ;;  %v1508_v26 = vadd.s32 %v1507_v38, %v1503_v54 }
 0x1e6   : > { %v1338_v1 = vsel %vm1336_vm0, %v2499_v48, %v1337_v16  ;;  %v1775_v19 = vsub.s32 32, %v1774_v56  ;;  %vm1332_vm4 = vweird.f32 %v3332_v29  ;;  %v1645_v28 = vadd.s32 3, %v1641_v5 }
 0x1e7   : > { %v1342_v6 = vsel %vm1335_vm3, %v1338_v1, %v1341_v30  ;;  %v1631_v13 = vor.u32 4788187, %v1630_v39  ;;  %v1509_v17 = vadd.s32 536870912, %v1508_v26  ;;  %v1768_v60 = vor.u32 8388608, %v1767_v35 }
 0x1e8   : > { %v1343_v41 = vsel %vm1332_vm4, nan, %v1342_v6  ;;  %v1778_v24 = vshrl.u32 %v2598_v55, %v1775_v19  ;;  %v1634_v10 = vcvt.s32.f32 %v1627_v45  ;;  %v1781_v25 = vshrl.u32 %v2599_v57, %v1775_v19 }
 0x1e9   : > { %2183 = vst [vmem:[%s3045_s8 + $0x38] sm:$0xff] %v1343_v41  ;;  %v1632_v36 = vand.u32 2147483647, %v1631_v13  ;;  %v491_v51 = vmul.f32 %v2756_v59, %v458_v11  ;;  %v1510_v23 = vshrl.u32 %v1509_v17, 30  ;;  %v1777_v47 = vshll.u32 %v2597_v52, %v1774_v56 }
 0x1ea   : > { %v1784_v29 = vshrl.u32 %v2600_v27, %v1775_v19  ;;  %v1787_v14 = vshrl.u32 %v2601_v61, %v1775_v19  ;;  %v1773_v9 = vshrl.u32 %v1772_v34, 5  ;;  %v1780_v22 = vshll.u32 %v2598_v55, %v1774_v56 }
 0x1eb   : > { %v1635_v37 = vmul.f32 %v1634_v10, %v1632_v36  ;;  %v1786_v2 = vshll.u32 %v2600_v27, %v1774_v56  ;;  %v1511_v63 = vshll.u32 %v1510_v23, 30  ;;  %v1779_v40 = vor.u32 %v1778_v24, %v1777_v47 }
 0x1ec   : > { %v1783_v4 = vshll.u32 %v2599_v57, %v1774_v56  ;;  %v1790_v21 = vshrl.u32 %v2602_v7, %v1775_v19  ;;  %v1782_v48 = vor.u32 %v1781_v25, %v1780_v22  ;;  %v1789_v54 = vshll.u32 %v2601_v61, %v1774_v56 }
 0x1ed   : > { %v1636_v33 = vxor.u32 2147483648, %v1635_v37  ;;  %v1788_v5 = vor.u32 %v1787_v14, %v1786_v2  ;;  %v3629_v32 = vsub.s32 %v1508_v26, %v1511_v63  ;;  %v1808_v15 = vshll.u32 %v1768_v60, 8 }
 0x1ee   : > { %v1785_v3 = vor.u32 %v1784_v29, %v1783_v4  ;;  %v3632_v34 = vadd.f32 %v491_v51, %v2744_v43  ;;  %v1776_v49 = vshrl.u32 %v2597_v52, %v1775_v19  ;;  %v1791_v8 = vor.u32 %v1790_v21, %v1789_v54 }
 0x1ef   : > { %v1637_v44 = vsel %vm1554_vm8, %v1636_v33, %v1635_v37  ;;  %vm1792_vm5 = vcmp.lt.s32.totalorder %v1773_v9, 1  ;;  %v1514_v35 = vsub.s32 0, %v3629_v32  ;;  %vm1793_vm6 = vcmp.lt.s32.totalorder %v1773_v9, 2 }
 0x1f0   : > { %v1640_v16 = vsel %vm3576_vm12, %v3390_v62, %v1637_v44  ;;  %vm1795_vm7 = vcmp.lt.s32.totalorder %v1773_v9, 4  ;;  %vm1794_vm10 = vcmp.lt.s32.totalorder %v1773_v9, 3  ;;  %v1800_v43 = vsel %vm1792_vm5, %v1779_v40, %v1782_v48 }
 0x1f1   : > { %2502 = vcosq.f32 %v1640_v16  ;;  %v1801_v56 = vsel %vm1795_vm7, %v1788_v5, 920167782  ;;  %v2313_v30 = vmin.u32 %v1514_v35, %v3629_v32  ;;  %v1797_v45 = vsel %vm1795_vm7, %v1785_v3, 2102212464 }
 0x1f2   : > { %2504 = vsinq.f32 %v1640_v16  ;;  %v1802_v39 = vsel %vm1794_vm10, %v1785_v3, %v1801_v56  ;;  %v1534_v38 = vsub.s32 4, %v1510_v23  ;;  %v1804_v53 = vsel %vm1792_vm5, %v1782_v48, %v1785_v3 }
 0x1f3   : > { %v1803_v1 = vsel %vm1793_vm6, %v1800_v43, %v1802_v39  ;;  %v1805_v26 = vsel %vm1795_vm7, %v1791_v8, 1326507024  ;;  %v1646_v19 = vand.u32 3, %v1645_v28  ;;  %v1516_v11 = vclz %v2313_v30 }
 0x1f4   : > { %v1796_v6 = vsel %vm1792_vm5, %v1776_v49, %v1779_v40  ;;  %v1798_v13 = vsel %vm1794_vm10, %v1782_v48, %v1797_v45  ;;  %v1806_v41 = vsel %vm1794_vm10, %v1788_v5, %v1805_v26  ;;  %vm1450_vm8 = vcmp.lt.s32.totalorder %v3499_v31, 0 }
 0x1f5   : > { %v3646_v17 = vmul.u32.u64.low %v1808_v15, %v1803_v1  ;;  %v3647_v60 = vmul.u32.u64.high %v1808_v15, %v1803_v1, %v3646_v17  ;;  %v2314_v24 = vadd.s32 4294967294, %v1516_v11  ;;  %v1807_v36 = vsel %vm1793_vm6, %v1804_v53, %v1806_v41 }
 0x1f6   : > { %v1659_v10 = vand.u32 2139095040, %v3632_v34  ;;  %v1535_v25 = vsel %vm1450_vm8, %v1534_v38, %v1510_v23  ;;  %v3654_v51 = vmul.u32.u64.low %v1808_v15, %v1807_v36  ;;  %v3655_v28 = vmul.u32.u64.high %v1808_v15, %v1807_v36, %v3654_v51 }
 0x1f7   : > { %vm1644_vm9 = vweird.f32 %v3390_v62  ;;  %vm3660_vm12 = vcmp.le.f32.partialorder %v1448_v18, 0.7853982  ;;  %vm2315_vm11 = vcmp.lt.s32.totalorder %v2314_v24, 0  ;;  %v1799_v29 = vsel %vm1793_vm6, %v1796_v6, %v1798_v13 }
 0x1f8   : > { %v1660_v14 = vshrl.u32 %v1659_v10, 23  ;;  %vm1647_vm13 = vcmp.lt.s32.totalorder %v1646_v19, 2  ;;  %v1504_v37 = vadd.s32 %v3590_v42, %v3595_v50  ;;  %v1519_v23 = vsel %vm2315_vm11, 0, %v2314_v24 }
 0x1f9   : > { %v1818_v22 = vadd.s32 1, %v3647_v60  ;;  %v1520_v2 = vsub.s32 32, %v1519_v23  ;;  %v1524_v63 = vsub.s32 4294967266, %v1519_v23  ;;  %v1537_v40 = vsel %vm3660_vm12, 0, %v1535_v25 }
 0x1fa   : > { %v2320_v18 = vadd.s32 4294967169, %v1660_v14  ;;  %v1521_v21 = vshll.u32 %v3629_v32, %v1519_v23  ;;  %v1815_v33 = vmul.u32 %v1808_v15, %v1799_v29  ;;  %vm1817_vm14 = vc.u32 %v3655_v28, %v3646_v17  ;;  %v470_v15 = vpop.permute.xlu0 %469 }
 0x1fb   : > { %v2503_v4 = vpop.eup %2502  ;;  %v1656_v9 = vand.u32 2147483647, %v3632_v34  ;;  %v1522_v42 = vshrl.u32 %v1504_v37, %v1520_v2  ;;  %v1525_v50 = vadd.s32 127, %v1524_v63  ;;  %v1819_v54 = vsel %vm1817_vm14, %v1818_v22, %v3647_v60 }
 0x1fc   : > { %v2505_v48 = vpop.eup %2504  ;;  %v1652_v5 = vxor.u32 2147483648, %v2503_v4  ;;  %vm1651_vm0 = vcmp.eq.s32.totalorder %v1646_v19, 2  ;;  %v1820_v44 = vadd.s32 %v1819_v54, %v1815_v33  ;;  %v1666_v49 = vadd.s32 1, %v2320_v18 }
 0x1fd   : > { %v1649_v3 = vxor.u32 2147483648, %v2505_v48  ;;  %vm1648_vm15 = vcmp.eq.s32.totalorder %v1646_v19, 0  ;;  %v1523_v16 = vor.u32 %v1522_v42, %v1521_v21  ;;  %v1526_v32 = vshll.u32 %v1525_v50, 23 }
 0x1fe   : > { %v1653_v8 = vsel %vm1651_vm0, %v1652_v5, %v2505_v48  ;;  %v1541_v43 = vadd.s32 3, %v1537_v40  ;;  %v1821_v56 = vadd.s32 536870912, %v1820_v44  ;;  %vm1667_vm1 = vcmp.gt.s32.totalorder %v1666_v49, 0 }
 0x1ff   : > { %v1650_v35 = vsel %vm1648_vm15, %v2503_v4, %v1649_v3  ;;  %v1527_v45 = vor.u32 4788187, %v1526_v32  ;;  %v1663_v39 = vand.u32 8388607, %v1656_v9  ;;  %v1668_v38 = vsel %vm1667_vm1, %v1666_v49, 0 }
 0x200   : > { %v1654_v30 = vsel %vm1647_vm13, %v1650_v35, %v1653_v8  ;;  %v1822_v53 = vshrl.u32 %v1821_v56, 30  ;;  %v1670_v26 = vand.u32 31, %v1668_v38  ;;  %v494_v11 = vmul.f32 %v2756_v59, %v470_v15 }
 0x201   : > { %v1655_v1 = vsel %vm1644_vm9, nan, %v1654_v30  ;;  %v1528_v6 = vand.u32 2147483647, %v1527_v45  ;;  %v1530_v13 = vcvt.s32.f32 %v1523_v16  ;;  %vm1762_vm2 = vcmp.lt.s32.totalorder %v3529_v0, 0 }
 0x202   : > { %2186 = vst [vmem:[%s3045_s8 + $0x50] sm:$0xff] %v1655_v1  ;;  %v1823_v41 = vshll.u32 %v1822_v53, 30  ;;  %v1671_v19 = vsub.s32 32, %v1670_v26  ;;  %v3682_v24 = vand.u32 3, %v1541_v43  ;;  %v1816_v36 = vadd.s32 %v3646_v17, %v3655_v28 }
 0x203   : > { %v1531_v60 = vmul.f32 %v1530_v13, %v1528_v6  ;;  %v1664_v10 = vor.u32 8388608, %v1663_v39  ;;  %v3687_v62 = vshrl.u32 %v1668_v38, 5  ;;  %v3691_v29 = vadd.f32 %v494_v11, %v2758_v20 }
 0x204   : > { %v3685_v25 = vsub.s32 %v1820_v44, %v1823_v41  ;;  %v1674_v51 = vshrl.u32 %v2598_v55, %v1671_v19  ;;  %v1673_v37 = vshll.u32 %v2597_v52, %v1670_v26  ;;  %v1677_v23 = vshrl.u32 %v2599_v57, %v1671_v19 }
 0x205   : > { %v1532_v14 = vxor.u32 2147483648, %v1531_v60  ;;  %v1680_v22 = vshrl.u32 %v2600_v27, %v1671_v19  ;;  %v1676_v17 = vshll.u32 %v2598_v55, %v1670_v26  ;;  %v1679_v28 = vshll.u32 %v2599_v57, %v1670_v26 }
 0x206   : > { %v1826_v2 = vsub.s32 0, %v3685_v25  ;;  %v1683_v63 = vshrl.u32 %v2601_v61, %v1671_v19  ;;  %v1846_v20 = vsub.s32 4, %v1822_v53  ;;  %v1675_v18 = vor.u32 %v1674_v51, %v1673_v37 }
 0x207   : > { %v1533_v40 = vsel %vm1450_vm8, %v1532_v14, %v1531_v60  ;;  %v1682_v4 = vshll.u32 %v2600_v27, %v1670_v26  ;;  %v1678_v48 = vor.u32 %v1677_v23, %v1676_v17  ;;  %v1681_v5 = vor.u32 %v1680_v22, %v1679_v28 }
 0x208   : > { %v1536_v21 = vsel %vm3660_vm12, %v3499_v31, %v1533_v40  ;;  %v2325_v33 = vmin.u32 %v1826_v2, %v3685_v25  ;;  %v1685_v50 = vshll.u32 %v2601_v61, %v1670_v26  ;;  %v1686_v54 = vshrl.u32 %v2602_v7, %v1671_v19 }
 0x209   : > { %2506 = vcosq.f32 %v1536_v21  ;;  %v1684_v42 = vor.u32 %v1683_v63, %v1682_v4  ;;  %vm3711_vm3 = vcmp.le.f32.partialorder %v1760_v12, 0.7853982  ;;  %v3715_v47 = vshll.u32 %v1664_v10, 8 }
 0x20a   : > { %2508 = vsinq.f32 %v1536_v21  ;;  %v1828_v44 = vclz %v2325_v33  ;;  %v1971_v49 = vand.u32 2139095040, %v3691_v29  ;;  %v1847_v8 = vsel %vm1762_vm2, %v1846_v20, %v1822_v53 }
 0x20b   : > { %v1672_v16 = vshrl.u32 %v2597_v52, %v1671_v19  ;;  %v1687_v32 = vor.u32 %v1686_v54, %v1685_v50  ;;  %vm1688_vm4 = vcmp.lt.s32.totalorder %v3687_v62, 1  ;;  %vm1690_vm5 = vcmp.lt.s32.totalorder %v3687_v62, 3 }
 0x20c   : > { %v2326_v15 = vadd.s32 4294967294, %v1828_v44  ;;  %vm1691_vm6 = vcmp.lt.s32.totalorder %v3687_v62, 4  ;;  %v1696_v12 = vsel %vm1688_vm4, %v1675_v18, %v1678_v48  ;;  %v1700_v56 = vsel %vm1688_vm4, %v1678_v48, %v1681_v5  ;;  %v466_v44 = vpop.permute.xlu1 %465 }
 0x20d   : > { %v1693_v35 = vsel %vm1691_vm6, %v1681_v5, 2102212464  ;;  %v1697_v43 = vsel %vm1691_vm6, %v1684_v42, 920167782  ;;  %v1701_v30 = vsel %vm1691_vm6, %v1687_v32, 1326507024  ;;  %v1692_v1 = vsel %vm1688_vm4, %v1672_v16, %v1675_v18 }
 0x20e   : > { %vm2327_vm7 = vcmp.lt.s32.totalorder %v2326_v15, 0  ;;  %vm1689_vm10 = vcmp.lt.s32.totalorder %v3687_v62, 2  ;;  %v1698_v45 = vsel %vm1690_vm5, %v1681_v5, %v1697_v43  ;;  %v1702_v39 = vsel %vm1690_vm5, %v1684_v42, %v1701_v30 }
 0x20f   : > { %vm1543_vm8 = vcmp.lt.s32.totalorder %v3682_v24, 2  ;;  %v1831_v38 = vsel %vm2327_vm7, 0, %v2326_v15  ;;  %v1699_v53 = vsel %vm1689_vm10, %v1696_v12, %v1698_v45  ;;  %v1703_v26 = vsel %vm1689_vm10, %v1700_v56, %v1702_v39 }
 0x210   : > { %vm1540_vm9 = vweird.f32 %v3499_v31  ;;  %v1832_v11 = vsub.s32 32, %v1831_v38  ;;  %v1836_v6 = vsub.s32 4294967266, %v1831_v38  ;;  %v1694_v13 = vsel %vm1690_vm5, %v1678_v48, %v1693_v35 }
 0x211   : > { %v1972_v41 = vshrl.u32 %v1971_v49, 23  ;;  %v3738_v19 = vmul.u32.u64.low %v3715_v47, %v1703_v26  ;;  %v3739_v60 = vmul.u32.u64.high %v3715_v47, %v1703_v26, %v3738_v19  ;;  %v1833_v14 = vshll.u32 %v3685_v25, %v1831_v38 }
 0x212   : > { %v3742_v10 = vmul.u32.u64.low %v3715_v47, %v1699_v53  ;;  %v3743_v51 = vmul.u32.u64.high %v3715_v47, %v1699_v53, %v3742_v10  ;;  %v1834_v37 = vshrl.u32 %v1816_v36, %v1832_v11  ;;  %v1837_v23 = vadd.s32 127, %v1836_v6 }
 0x213   : > { %v2332_v22 = vadd.s32 4294967169, %v1972_v41  ;;  %v2507_v2 = vpop.eup %2506  ;;  %vm1544_vm12 = vcmp.eq.s32.totalorder %v3682_v24, 0  ;;  %vm1547_vm11 = vcmp.eq.s32.totalorder %v3682_v24, 2  ;;  %v1849_v17 = vsel %vm3711_vm3, 0, %v1847_v8 }
 0x214   : > { %v1695_v28 = vsel %vm1689_vm10, %v1692_v1, %v1694_v13  ;;  %v2509_v63 = vpop.eup %2508  ;;  %v1548_v40 = vxor.u32 2147483648, %v2507_v2  ;;  %v1835_v20 = vor.u32 %v1834_v37, %v1833_v14  ;;  %v1838_v18 = vshll.u32 %v1837_v23, 23 }
 0x215   : > { %v1978_v4 = vadd.s32 1, %v2332_v22  ;;  %v1545_v25 = vxor.u32 2147483648, %v2509_v63  ;;  %vm1713_vm13 = vc.u32 %v3739_v60, %v3742_v10  ;;  %v1714_v36 = vadd.s32 1, %v3743_v51 }
 0x216   : > { %v1968_v21 = vand.u32 2147483647, %v3691_v29  ;;  %v1549_v33 = vsel %vm1547_vm11, %v1548_v40, %v2509_v63  ;;  %v1839_v48 = vor.u32 4788187, %v1838_v18  ;;  %v1711_v5 = vmul.u32 %v3715_v47, %v1695_v28 }
 0x217   : > { %vm1979_vm14 = vcmp.gt.s32.totalorder %v1978_v4, 0  ;;  %v1546_v62 = vsel %vm1544_vm12, %v2507_v2, %v1545_v25  ;;  %v1853_v42 = vadd.s32 3, %v1849_v17  ;;  %v1715_v50 = vsel %vm1713_vm13, %v1714_v36, %v3743_v51 }
 0x218   : > { %v1980_v54 = vsel %vm1979_vm14, %v1978_v4, 0  ;;  %v1550_v49 = vsel %vm1543_vm8, %v1546_v62, %v1549_v33  ;;  %v1840_v8 = vand.u32 2147483647, %v1839_v48  ;;  %v1842_v16 = vcvt.s32.f32 %v1835_v20 }
 0x219   : > { %v1716_v32 = vadd.s32 %v1715_v50, %v1711_v5  ;;  %v1551_v15 = vsel %vm1540_vm9, nan, %v1550_v49  ;;  %v1982_v12 = vand.u32 31, %v1980_v54  ;;  %v493_v43 = vmul.f32 %v2756_v59, %v466_v44 }
 0x21a   : > { %2185 = vst [vmem:[%s3045_s8 + $0x48] sm:$0xff] %v1551_v15  ;;  %v1843_v47 = vmul.f32 %v1842_v16, %v1840_v8  ;;  %v3767_v56 = vand.u32 3, %v1853_v42  ;;  %v1975_v30 = vand.u32 8388607, %v1968_v21  ;;  %v1981_v45 = vshrl.u32 %v1980_v54, 5  ;;  %v474_v16 = vpop.permute.xlu1 %473 }
 0x21b   : > { %v1717_v35 = vadd.s32 536870912, %v1716_v32  ;;  %v1983_v24 = vsub.s32 32, %v1982_v12  ;;  %v1985_v1 = vshll.u32 %v2597_v52, %v1982_v12  ;;  %v1988_v31 = vshll.u32 %v2598_v55, %v1982_v12 }
 0x21c   : > { %v1844_v39 = vxor.u32 2147483648, %v1843_v47  ;;  %v1991_v11 = vshll.u32 %v2599_v57, %v1982_v12  ;;  %v1994_v19 = vshll.u32 %v2600_v27, %v1982_v12  ;;  %v1976_v17 = vor.u32 8388608, %v1975_v30 }
 0x21d   : > { %v3771_v38 = vshrl.u32 %v1717_v35, 30  ;;  %v1986_v53 = vshrl.u32 %v2598_v55, %v1983_v24  ;;  %v1989_v26 = vshrl.u32 %v2599_v57, %v1983_v24  ;;  %v1992_v6 = vshrl.u32 %v2600_v27, %v1983_v24 }
 0x21e   : > { %v1845_v13 = vsel %vm1762_vm2, %v1844_v39, %v1843_v47  ;;  %v1995_v51 = vshrl.u32 %v2601_v61, %v1983_v24  ;;  %v1997_v63 = vshll.u32 %v2601_v61, %v1982_v12  ;;  %v1998_v40 = vshrl.u32 %v2602_v7, %v1983_v24 }
 0x21f   : > { %v1719_v41 = vshll.u32 %v3771_v38, 30  ;;  %v1848_v14 = vsel %vm3711_vm3, %v3529_v0, %v1845_v13  ;;  %v1987_v37 = vor.u32 %v1986_v53, %v1985_v1  ;;  %v1990_v23 = vor.u32 %v1989_v26, %v1988_v31 }
 0x220   : > { %v1993_v22 = vor.u32 %v1992_v6, %v1991_v11  ;;  %2510 = vcosq.f32 %v1848_v14  ;;  %v1996_v28 = vor.u32 %v1995_v51, %v1994_v19  ;;  %v3792_v20 = vadd.f32 %v493_v43, %v2749_v46 }
 0x221   : > { %v3787_v2 = vsub.s32 %v1716_v32, %v1719_v41  ;;  %2512 = vsinq.f32 %v1848_v14  ;;  %vm1658_vm0 = vcmp.lt.s32.totalorder %v3632_v34, 0  ;;  %vm2000_vm15 = vcmp.lt.s32.totalorder %v1981_v45, 1 }
 0x222   : > { %vm2002_vm1 = vcmp.lt.s32.totalorder %v1981_v45, 3  ;;  %vm2003_vm2 = vcmp.lt.s32.totalorder %v1981_v45, 4  ;;  %v1999_v18 = vor.u32 %v1998_v40, %v1997_v63  ;;  %v2008_v25 = vsel %vm2000_vm15, %v1987_v37, %v1990_v23 }
 0x223   : > { %v1722_v3 = vsub.s32 0, %v3787_v2  ;;  %v2005_v4 = vsel %vm2003_vm2, %v1993_v22, 2102212464  ;;  %v2009_v36 = vsel %vm2003_vm2, %v1996_v28, 920167782  ;;  %v1984_v48 = vshrl.u32 %v2597_v52, %v1983_v24 }
 0x224   : > { %vm2001_vm3 = vcmp.lt.s32.totalorder %v1981_v45, 2  ;;  %v2010_v46 = vsel %vm2002_vm1, %v1993_v22, %v2009_v36  ;;  %v2012_v62 = vsel %vm2000_vm15, %v1990_v23, %v1993_v22  ;;  %v2013_v42 = vsel %vm2003_vm2, %v1999_v18, 1326507024 }
 0x225   : > { %v2321_v33 = vmin.u32 %v1722_v3, %v3787_v2  ;;  %v2011_v5 = vsel %vm2001_vm3, %v2008_v25, %v2010_v46  ;;  %v2016_v50 = vshll.u32 %v1976_v17, 8  ;;  %vm1855_vm4 = vcmp.lt.s32.totalorder %v3767_v56, 2 }
 0x226   : > { %vm1856_vm5 = vcmp.eq.s32.totalorder %v3767_v56, 0  ;;  %vm3806_vm6 = vcmp.le.f32.partialorder %v1656_v9, 0.7853982  ;;  %v2004_v49 = vsel %vm2000_vm15, %v1984_v48, %v1987_v37  ;;  %v2006_v8 = vsel %vm2002_vm1, %v1990_v23, %v2005_v4 }
 0x227   : > { %v1724_v44 = vclz %v2321_v33  ;;  %vm1852_vm7 = vweird.f32 %v3529_v0  ;;  %v1742_v32 = vsub.s32 4, %v3771_v38  ;;  %v2014_v15 = vsel %vm2002_vm1, %v1996_v28, %v2013_v42 }
 0x228   : > { %v3815_v12 = vmul.u32.u64.low %v2016_v50, %v2011_v5  ;;  %v3816_v47 = vmul.u32.u64.high %v2016_v50, %v2011_v5, %v3815_v12  ;;  %vm1859_vm10 = vcmp.eq.s32.totalorder %v3767_v56, 2  ;;  %v2015_v35 = vsel %vm2001_vm3, %v2012_v62, %v2014_v15 }
 0x229   : > { %v2322_v9 = vadd.s32 4294967294, %v1724_v44  ;;  %v1867_v43 = vand.u32 2139095040, %v3792_v20  ;;  %v2007_v30 = vsel %vm2001_vm3, %v2004_v49, %v2006_v8  ;;  %v495_v1 = vmul.f32 %v2756_v59, %v474_v16 }
 0x22a   : > { %v3823_v24 = vmul.u32.u64.low %v2016_v50, %v2015_v35  ;;  %v3824_v39 = vmul.u32.u64.high %v2016_v50, %v2015_v35, %v3823_v24  ;;  %v2511_v31 = vpop.eup %2510  ;;  %v1712_v53 = vadd.s32 %v3742_v10, %v3739_v60  ;;  %v1864_v26 = vand.u32 2147483647, %v3792_v20 }
 0x22b   : > { %vm2323_vm8 = vcmp.lt.s32.totalorder %v2322_v9, 0  ;;  %v1868_v11 = vshrl.u32 %v1867_v43, 23  ;;  %v2513_v6 = vpop.eup %2512  ;;  %v1860_v13 = vxor.u32 2147483648, %v2511_v31  ;;  %v1743_v45 = vsel %vm1658_vm0, %v1742_v32, %v3771_v38 }
 0x22c   : > { %v1727_v41 = vsel %vm2323_vm8, 0, %v2322_v9  ;;  %v2026_v19 = vadd.s32 1, %v3816_v47  ;;  %v1857_v51 = vxor.u32 2147483648, %v2513_v6  ;;  %v2023_v37 = vmul.u32 %v2016_v50, %v2007_v30 }
 0x22d   : > { %v1728_v14 = vsub.s32 32, %v1727_v41  ;;  %v1732_v59 = vsub.s32 4294967266, %v1727_v41  ;;  %v1861_v60 = vsel %vm1859_vm10, %v1860_v13, %v2513_v6  ;;  %v1729_v10 = vshll.u32 %v3787_v2, %v1727_v41 }
 0x22e   : > { %vm2025_vm9 = vc.u32 %v3824_v39, %v3815_v12  ;;  %v2328_v23 = vadd.s32 4294967169, %v1868_v11  ;;  %v1858_v22 = vsel %vm1856_vm5, %v2511_v31, %v1857_v51  ;;  %v1745_v40 = vsel %vm3806_vm6, 0, %v1743_v45 }
 0x22f   : > { %v1730_v38 = vshrl.u32 %v1712_v53, %v1728_v14  ;;  %v1733_v17 = vadd.s32 127, %v1732_v59  ;;  %v2027_v28 = vsel %vm2025_vm9, %v2026_v19, %v3816_v47  ;;  %v1862_v63 = vsel %vm1855_vm4, %v1858_v22, %v1861_v60 }
 0x230   : > { %v2028_v3 = vadd.s32 %v2027_v28, %v2023_v37  ;;  %v1874_v18 = vadd.s32 1, %v2328_v23  ;;  %v1863_v2 = vsel %vm1852_vm7, nan, %v1862_v63  ;;  %v1749_v48 = vadd.s32 3, %v1745_v40 }
 0x231   : > { %v1731_v4 = vor.u32 %v1730_v38, %v1729_v10  ;;  %v1734_v25 = vshll.u32 %v1733_v17, 23  ;;  %2188 = vst [vmem:[%s3045_s8 + $0x60] sm:$0xff] %v1863_v2  ;;  %v1871_v56 = vand.u32 8388607, %v1864_v26  ;;  %v3854_v42 = vadd.f32 %v495_v1, %v2760_v58 }
 0x232   : > { %v2029_v36 = vadd.s32 536870912, %v2028_v3  ;;  %vm1875_vm12 = vcmp.gt.s32.totalorder %v1874_v18, 0  ;;  %v3857_v16 = vand.u32 3, %v1749_v48  ;;  %v2024_v10 = vadd.s32 %v3815_v12, %v3824_v39 }
 0x233   : > { %v1735_v33 = vor.u32 4788187, %v1734_v25  ;;  %v1876_v46 = vsel %vm1875_vm12, %v1874_v18, 0  ;;  %v1738_v0 = vcvt.s32.f32 %v1731_v4  ;;  %v1872_v15 = vor.u32 8388608, %v1871_v56 }
 0x234   : > { %v3849_v5 = vshrl.u32 %v2029_v36, 30  ;;  %v1878_v62 = vand.u32 31, %v1876_v46  ;;  %v2075_v9 = vand.u32 2139095040, %v3854_v42  ;;  %v1877_v6 = vshrl.u32 %v1876_v46, 5 }
 0x235   : > { %v1736_v50 = vand.u32 2147483647, %v1735_v33  ;;  %v1912_v22 = vshll.u32 %v1872_v15, 8  ;;  %vm1751_vm2 = vcmp.lt.s32.totalorder %v3857_v16, 2  ;;  %vm1748_vm3 = vweird.f32 %v3632_v34 }
 0x236   : > { %v2031_v44 = vshll.u32 %v3849_v5, 30  ;;  %v1879_v49 = vsub.s32 32, %v1878_v62  ;;  %v1881_v43 = vshll.u32 %v2597_v52, %v1878_v62  ;;  %v1884_v1 = vshll.u32 %v2598_v55, %v1878_v62 }
 0x237   : > { %v1739_v8 = vmul.f32 %v1738_v0, %v1736_v50  ;;  %v1887_v31 = vshll.u32 %v2599_v57, %v1878_v62  ;;  %v1890_v41 = vshll.u32 %v2600_v27, %v1878_v62  ;;  %v1893_v37 = vshll.u32 %v2601_v61, %v1878_v62 }
 0x238   : > { %v3859_v32 = vsub.s32 %v2028_v3, %v2031_v44  ;;  %v1882_v47 = vshrl.u32 %v2598_v55, %v1879_v49  ;;  %v1885_v58 = vshrl.u32 %v2599_v57, %v1879_v49  ;;  %v1888_v30 = vshrl.u32 %v2600_v27, %v1879_v49 }
 0x239   : > { %v1740_v35 = vxor.u32 2147483648, %v1739_v8  ;;  %v1891_v53 = vshrl.u32 %v2601_v61, %v1879_v49  ;;  %v1894_v60 = vshrl.u32 %v2602_v7, %v1879_v49  ;;  %v1880_v38 = vshrl.u32 %v2597_v52, %v1879_v49 }
 0x23a   : > { %v2034_v24 = vsub.s32 0, %v3859_v32  ;;  %v1883_v13 = vor.u32 %v1882_v47, %v1881_v43  ;;  %v1886_v51 = vor.u32 %v1885_v58, %v1884_v1  ;;  %v1889_v14 = vor.u32 %v1888_v30, %v1887_v31 }
 0x23b   : > { %v1741_v11 = vsel %vm1658_vm0, %v1740_v35, %v1739_v8  ;;  %v1892_v59 = vor.u32 %v1891_v53, %v1890_v41  ;;  %v1895_v54 = vor.u32 %v1894_v60, %v1893_v37  ;;  %vm1896_vm11 = vcmp.lt.s32.totalorder %v1877_v6, 1 }
 0x23c   : > { %v1744_v45 = vsel %vm3806_vm6, %v3632_v34, %v1741_v11  ;;  %v2333_v19 = vmin.u32 %v2034_v24, %v3859_v32  ;;  %v2076_v17 = vshrl.u32 %v2075_v9, 23  ;;  %vm1898_vm13 = vcmp.lt.s32.totalorder %v1877_v6, 3 }
 0x23d   : > { %2514 = vcosq.f32 %v1744_v45  ;;  %vm1899_vm14 = vcmp.lt.s32.totalorder %v1877_v6, 4  ;;  %v1904_v63 = vsel %vm1896_vm11, %v1883_v13, %v1886_v51  ;;  %v1908_v18 = vsel %vm1896_vm11, %v1886_v51, %v1889_v14 }
 0x23e   : > { %2516 = vsinq.f32 %v1744_v45  ;;  %v2036_v23 = vclz %v2333_v19  ;;  %v1901_v40 = vsel %vm1899_vm14, %v1889_v14, 2102212464  ;;  %v1905_v3 = vsel %vm1899_vm14, %v1892_v59, 920167782 }
 0x23f   : > { %v1909_v2 = vsel %vm1899_vm14, %v1895_v54, 1326507024  ;;  %vm1970_vm0 = vcmp.lt.s32.totalorder %v3691_v29, 0  ;;  %vm1897_vm1 = vcmp.lt.s32.totalorder %v1877_v6, 2  ;;  %v1906_v12 = vsel %vm1898_vm13, %v1889_v14, %v1905_v3 }
 0x240   : > { %v2334_v28 = vadd.s32 4294967294, %v2036_v23  ;;  %v1910_v39 = vsel %vm1898_vm13, %v1892_v59, %v1909_v2  ;;  %v1900_v25 = vsel %vm1896_vm11, %v1880_v38, %v1883_v13  ;;  %v1907_v36 = vsel %vm1897_vm1, %v1904_v63, %v1906_v12 }
 0x241   : > { %v1911_v33 = vsel %vm1897_vm1, %v1908_v18, %v1910_v39  ;;  %v1902_v56 = vsel %vm1898_vm13, %v1886_v51, %v1901_v40  ;;  %v2336_v62 = vadd.s32 4294967169, %v2076_v17  ;;  %vm1752_vm4 = vcmp.eq.s32.totalorder %v3857_v16, 0 }
 0x242   : > { %vm2335_vm15 = vcmp.lt.s32.totalorder %v2334_v28, 0  ;;  %v3893_v50 = vmul.u32.u64.low %v1912_v22, %v1911_v33  ;;  %v3894_v0 = vmul.u32.u64.high %v1912_v22, %v1911_v33, %v3893_v50  ;;  %vm1755_vm5 = vcmp.eq.s32.totalorder %v3857_v16, 2 }
 0x243   : > { %v2039_v4 = vsel %vm2335_vm15, 0, %v2334_v28  ;;  %v3896_v44 = vmul.u32.u64.low %v1912_v22, %v1907_v36  ;;  %v3897_v49 = vmul.u32.u64.high %v1912_v22, %v1907_v36, %v3896_v44  ;;  %v2082_v9 = vadd.s32 1, %v2336_v62 }
 0x244   : > { %v2040_v48 = vsub.s32 32, %v2039_v4  ;;  %v2044_v46 = vsub.s32 4294967266, %v2039_v4  ;;  %v2041_v8 = vshll.u32 %v3859_v32, %v2039_v4  ;;  %v2054_v43 = vsub.s32 4, %v3849_v5 }
 0x245   : > { %v1903_v58 = vsel %vm1897_vm1, %v1900_v25, %v1902_v56  ;;  %vm2083_vm6 = vcmp.gt.s32.totalorder %v2082_v9, 0  ;;  %vm1921_vm7 = vc.u32 %v3894_v0, %v3896_v44  ;;  %v1922_v32 = vadd.s32 1, %v3897_v49 }
 0x246   : > { %v2042_v15 = vshrl.u32 %v2024_v10, %v2040_v48  ;;  %v2045_v47 = vadd.s32 127, %v2044_v46  ;;  %v2072_v11 = vand.u32 2147483647, %v3854_v42  ;;  %v1919_v45 = vmul.u32 %v1912_v22, %v1903_v58 }
 0x247   : > { %v2515_v35 = vpop.eup %2514  ;;  %v2084_v19 = vsel %vm2083_vm6, %v2082_v9, 0  ;;  %v2055_v51 = vsel %vm1970_vm0, %v2054_v43, %v3849_v5  ;;  %v1923_v14 = vsel %vm1921_vm7, %v1922_v32, %v3897_v49  ;;  %vm3921_vm10 = vcmp.le.f32.partialorder %v1968_v21, 0.7853982 }
 0x248   : > { %v2517_v30 = vpop.eup %2516  ;;  %v1756_v24 = vxor.u32 2147483648, %v2515_v35  ;;  %v2043_v1 = vor.u32 %v2042_v15, %v2041_v8  ;;  %v2046_v31 = vshll.u32 %v2045_v47, 23  ;;  %v2086_v59 = vand.u32 31, %v2084_v19 }
 0x249   : > { %v1753_v53 = vxor.u32 2147483648, %v2517_v30  ;;  %v1924_v23 = vadd.s32 %v1923_v14, %v1919_v45  ;;  %v2079_v5 = vand.u32 8388607, %v2072_v11  ;;  %v2057_v16 = vsel %vm3921_vm10, 0, %v2055_v51 }
 0x24a   : > { %v1757_v13 = vsel %vm1755_vm5, %v1756_v24, %v2517_v30  ;;  %v2047_v41 = vor.u32 4788187, %v2046_v31  ;;  %v2050_v10 = vcvt.s32.f32 %v2043_v1  ;;  %v2087_v54 = vsub.s32 32, %v2086_v59 }
 0x24b   : > { %v1754_v6 = vsel %vm1752_vm4, %v2515_v35, %v1753_v53  ;;  %v1925_v28 = vadd.s32 536870912, %v1924_v23  ;;  %v2085_v63 = vshrl.u32 %v2084_v19, 5  ;;  %v2089_v34 = vshll.u32 %v2597_v52, %v2086_v59 }
 0x24c   : > { %v1758_v37 = vsel %vm1751_vm2, %v1754_v6, %v1757_v13  ;;  %v2048_v60 = vand.u32 2147483647, %v2047_v41  ;;  %v2090_v40 = vshrl.u32 %v2598_v55, %v2087_v54  ;;  %v2092_v21 = vshll.u32 %v2598_v55, %v2086_v59 }
 0x24d   : > { %v1759_v22 = vsel %vm1748_vm3, nan, %v1758_v37  ;;  %v2093_v3 = vshrl.u32 %v2599_v57, %v2087_v54  ;;  %v3934_v2 = vshrl.u32 %v1925_v28, 30  ;;  %v2096_v12 = vshrl.u32 %v2600_v27, %v2087_v54 }
 0x24e   : > { %2187 = vst [vmem:[%s3045_s8 + $0x58] sm:$0xff] %v1759_v22  ;;  %v2051_v17 = vmul.f32 %v2050_v10, %v2048_v60  ;;  %v2099_v39 = vshrl.u32 %v2601_v61, %v2087_v54  ;;  %v2095_v4 = vshll.u32 %v2599_v57, %v2086_v59  ;;  %v2098_v25 = vshll.u32 %v2600_v27, %v2086_v59 }
 0x24f   : > { %v2101_v36 = vshll.u32 %v2601_v61, %v2086_v59  ;;  %v2102_v33 = vshrl.u32 %v2602_v7, %v2087_v54  ;;  %v1927_v48 = vshll.u32 %v3934_v2, 30  ;;  %v2091_v46 = vor.u32 %v2090_v40, %v2089_v34 }
 0x250   : > { %v2052_v18 = vxor.u32 2147483648, %v2051_v17  ;;  %v2094_v56 = vor.u32 %v2093_v3, %v2092_v21  ;;  %v2100_v50 = vor.u32 %v2099_v39, %v2098_v25  ;;  %v2097_v27 = vor.u32 %v2096_v12, %v2095_v4 }
 0x251   : > { %v2103_v49 = vor.u32 %v2102_v33, %v2101_v36  ;;  %v1928_v57 = vsub.s32 %v1924_v23, %v1927_v48  ;;  %v2061_v61 = vadd.s32 3, %v2057_v16  ;;  %v2080_v8 = vor.u32 8388608, %v2079_v5 }
 0x252   : > { %v2053_v55 = vsel %vm1970_vm0, %v2052_v18, %v2051_v17  ;;  %vm2104_vm8 = vcmp.lt.s32.totalorder %v2085_v63, 1  ;;  %v2088_v15 = vshrl.u32 %v2597_v52, %v2087_v54  ;;  %vm2107_vm9 = vcmp.lt.s32.totalorder %v2085_v63, 4 }
 0x253   : > { %v2056_v62 = vsel %vm3921_vm10, %v3691_v29, %v2053_v55  ;;  %v1930_v7 = vsub.s32 0, %v1928_v57  ;;  %v2112_v47 = vsel %vm2104_vm8, %v2091_v46, %v2094_v56  ;;  %vm2105_vm12 = vcmp.lt.s32.totalorder %v2085_v63, 2 }
 0x254   : > { %2518 = vcosq.f32 %v2056_v62  ;;  %vm2106_vm11 = vcmp.lt.s32.totalorder %v2085_v63, 3  ;;  %v2113_v9 = vsel %vm2107_vm9, %v2100_v50, 920167782  ;;  %v2117_v35 = vsel %vm2107_vm9, %v2103_v49, 1326507024 }
 0x255   : > { %2520 = vsinq.f32 %v2056_v62  ;;  %v2329_v43 = vmin.u32 %v1930_v7, %v1928_v57  ;;  %v2109_v58 = vsel %vm2107_vm9, %v2097_v27, 2102212464  ;;  %v2114_v30 = vsel %vm2106_vm11, %v2097_v27, %v2113_v9 }
 0x256   : > { %v2116_v24 = vsel %vm2104_vm8, %v2094_v56, %v2097_v27  ;;  %v2115_v1 = vsel %vm2105_vm12, %v2112_v47, %v2114_v30  ;;  %v2118_v31 = vsel %vm2106_vm11, %v2100_v50, %v2117_v35  ;;  %v2120_v53 = vshll.u32 %v2080_v8, 8 }
 0x257   : > { %v2062_v32 = vand.u32 3, %v2061_v61  ;;  %v1932_v13 = vclz %v2329_v43  ;;  %v2108_v52 = vsel %vm2104_vm8, %v2088_v15, %v2091_v46  ;;  %v2110_v41 = vsel %vm2106_vm11, %v2094_v56, %v2109_v58 }
 0x258   : > { %v2119_v45 = vsel %vm2105_vm12, %v2116_v24, %v2118_v31  ;;  %v3954_v19 = vmul.u32.u64.low %v2120_v53, %v2115_v1  ;;  %v3955_v6 = vmul.u32.u64.high %v2120_v53, %v2115_v1, %v3954_v19  ;;  %v2111_v60 = vsel %vm2105_vm12, %v2108_v52, %v2110_v41 }
 0x259   : > { %v2330_v51 = vadd.s32 4294967294, %v1932_v13  ;;  %v3957_v14 = vmul.u32.u64.low %v2120_v53, %v2119_v45  ;;  %v3958_v59 = vmul.u32.u64.high %v2120_v53, %v2119_v45, %v3957_v14  ;;  %vm2063_vm13 = vcmp.lt.s32.totalorder %v2062_v32, 2 }
 0x25a   : > { %vm2064_vm14 = vcmp.eq.s32.totalorder %v2062_v32, 0  ;;  %vm2067_vm15 = vcmp.eq.s32.totalorder %v2062_v32, 2  ;;  %v2130_v38 = vadd.s32 1, %v3955_v6  ;;  %v1920_v54 = vadd.s32 %v3896_v44, %v3894_v0 }
 0x25b   : > { %vm2331_vm0 = vcmp.lt.s32.totalorder %v2330_v51, 0  ;;  %v2127_v40 = vmul.u32 %v2120_v53, %v2111_v60  ;;  %vm2129_vm1 = vc.u32 %v3958_v59, %v3954_v19  ;;  %vm2060_vm2 = vweird.f32 %v3691_v29 }
 0x25c   : > { %v1935_v22 = vsel %vm2331_vm0, 0, %v2330_v51  ;;  %v2131_v18 = vsel %vm2129_vm1, %v2130_v38, %v3955_v6  ;;  %v1950_v62 = vsub.s32 4, %v3934_v2  ;;  %vm1866_vm3 = vcmp.lt.s32.totalorder %v3792_v20, 0 }
 0x25d   : > { %v1936_v17 = vsub.s32 32, %v1935_v22  ;;  %v1940_v16 = vsub.s32 4294967266, %v1935_v22  ;;  %v1937_v34 = vshll.u32 %v1928_v57, %v1935_v22  ;;  %v2132_v39 = vadd.s32 %v2131_v18, %v2127_v40 }
 0x25e   : > { %v2519_v37 = vpop.eup %2518  ;;  %vm1865_vm4 = vcmp.le.f32.partialorder %v1864_v26, 0.7853982  ;;  %v1951_v27 = vsel %vm1866_vm3, %v1950_v62, %v3934_v2  ;;  %v2128_v43 = vadd.s32 %v3954_v19, %v3958_v59  ;;  %vm1956_vm8 = vweird.f32 %v3792_v20 }
 0x25f   : > { %v2521_v10 = vpop.eup %2520  ;;  %v2068_v23 = vxor.u32 2147483648, %v2519_v37  ;;  %v1938_v21 = vshrl.u32 %v1920_v54, %v1936_v17  ;;  %v1941_v3 = vadd.s32 127, %v1940_v16  ;;  %v2133_v25 = vadd.s32 536870912, %v2132_v39 }
 0x260   : > { %v2065_v5 = vxor.u32 2147483648, %v2521_v10  ;;  %v1953_v7 = vsel %vm1865_vm4, 0, %v1951_v27  ;;  %vm2074_vm9 = vcmp.lt.s32.totalorder %v3854_v42, 0  ;;  %vm2073_vm12 = vcmp.le.f32.partialorder %v2072_v11, 0.7853982 }
 0x261   : > { %v2069_v28 = vsel %vm2067_vm15, %v2068_v23, %v2521_v10  ;;  %v1939_v44 = vor.u32 %v1938_v21, %v1937_v34  ;;  %v1942_v4 = vshll.u32 %v1941_v3, 23  ;;  %v2134_v33 = vshrl.u32 %v2133_v25, 30 }
 0x262   : > { %v2066_v63 = vsel %vm2064_vm14, %v2519_v37, %v2065_v5  ;;  %v1957_v9 = vadd.s32 3, %v1953_v7  ;;  %vm2164_vm0 = vweird.f32 %v3854_v42 }
 0x263   : > { %v2070_v12 = vsel %vm2063_vm13, %v2066_v63, %v2069_v28  ;;  %v1943_v36 = vor.u32 4788187, %v1942_v4  ;;  %v1946_v48 = vcvt.s32.f32 %v1939_v44  ;;  %v2135_v46 = vshll.u32 %v2134_v33, 30 }
 0x264   : > { %v2071_v0 = vsel %vm2060_vm2, nan, %v2070_v12  ;;  %v1958_v24 = vand.u32 3, %v1957_v9  ;;  %v2158_v10 = vsub.s32 4, %v2134_v33 }
 0x265   : > { %2190 = vst [vmem:[%s3045_s8 + $0x70] sm:$0xff] %v2071_v0  ;;  %v1944_v55 = vand.u32 2147483647, %v1943_v36  ;;  %v2136_v50 = vsub.s32 %v2132_v39, %v2135_v46 }
 0x266   : > { %vm1963_vm6 = vcmp.eq.s32.totalorder %v1958_v24, 2  ;;  %vm1960_vm7 = vcmp.eq.s32.totalorder %v1958_v24, 0  ;;  %vm1959_vm10 = vcmp.lt.s32.totalorder %v1958_v24, 2  ;;  %v2159_v38 = vsel %vm2074_vm9, %v2158_v10, %v2134_v33 }
 0x267   : > { %v1947_v56 = vmul.f32 %v1946_v48, %v1944_v55  ;;  %v2138_v29 = vsub.s32 0, %v2136_v50 }
 0x269   : > { %v1948_v49 = vxor.u32 2147483648, %v1947_v56  ;;  %v2337_v8 = vmin.u32 %v2138_v29, %v2136_v50 }
 0x26b   : > { %v1949_v57 = vsel %vm1866_vm3, %v1948_v49, %v1947_v56  ;;  %v2140_v15 = vclz %v2337_v8 }
 0x26c   : > { %v1952_v61 = vsel %vm1865_vm4, %v3792_v20, %v1949_v57  ;;  %v2161_v20 = vsel %vm2073_vm12, 0, %v2159_v38 }
 0x26d   : > { %2522 = vcosq.f32 %v1952_v61  ;;  %v2338_v47 = vadd.s32 4294967294, %v2140_v15  ;;  %v2165_v54 = vadd.s32 3, %v2161_v20 }
 0x26e   : > { %2524 = vsinq.f32 %v1952_v61 }
 0x26f   : > { %vm2339_vm5 = vcmp.lt.s32.totalorder %v2338_v47, 0  ;;  %v2166_v17 = vand.u32 3, %v2165_v54 }
 0x270   : > { %v2143_v35 = vsel %vm2339_vm5, 0, %v2338_v47 }
 0x271   : > { %v2144_v58 = vsub.s32 32, %v2143_v35  ;;  %v2148_v30 = vsub.s32 4294967266, %v2143_v35  ;;  %v2145_v26 = vshll.u32 %v2136_v50, %v2143_v35  ;;  %vm2171_vm11 = vcmp.eq.s32.totalorder %v2166_v17, 2 }
 0x272   : > { %vm2168_vm13 = vcmp.eq.s32.totalorder %v2166_v17, 0  ;;  %vm2167_vm14 = vcmp.lt.s32.totalorder %v2166_v17, 2 }
 0x273   : > { %v2146_v1 = vshrl.u32 %v2128_v43, %v2144_v58  ;;  %v2149_v31 = vadd.s32 127, %v2148_v30 }
 0x275   : > { %v2147_v13 = vor.u32 %v2146_v1, %v2145_v26  ;;  %v2150_v52 = vshll.u32 %v2149_v31, 23 }
 0x277   : > { %v2523_v2 = vpop.eup %2522  ;;  %v2151_v6 = vor.u32 4788187, %v2150_v52  ;;  %v2154_v59 = vcvt.s32.f32 %v2147_v13 }
 0x278   : > { %v2525_v53 = vpop.eup %2524  ;;  %v1964_v32 = vxor.u32 2147483648, %v2523_v2 }
 0x279   : > { %v1961_v41 = vxor.u32 2147483648, %v2525_v53  ;;  %v2152_v14 = vand.u32 2147483647, %v2151_v6 }
 0x27a   : > { %v1965_v45 = vsel %vm1963_vm6, %v1964_v32, %v2525_v53 }
 0x27b   : > { %v1962_v51 = vsel %vm1960_vm7, %v2523_v2, %v1961_v41  ;;  %v2155_v60 = vmul.f32 %v2154_v59, %v2152_v14 }
 0x27c   : > { %v1966_v19 = vsel %vm1959_vm10, %v1962_v51, %v1965_v45 }
 0x27d   : > { %v1967_v37 = vsel %vm1956_vm8, nan, %v1966_v19  ;;  %v2156_v23 = vxor.u32 2147483648, %v2155_v60 }
 0x27e   : > { %2189 = vst [vmem:[%s3045_s8 + $0x68] sm:$0xff] %v1967_v37 }
 0x27f   : > { %v2157_v22 = vsel %vm2074_vm9, %v2156_v23, %v2155_v60 }
 0x280   : > { %v2160_v5 = vsel %vm2073_vm12, %v3854_v42, %v2157_v22 }
 0x281   : > { %2526 = vcosq.f32 %v2160_v5 }
 0x282   : > { %2528 = vsinq.f32 %v2160_v5 }
 0x28b   : > { %v2527_v16 = vpop.eup %2526 }
 0x28c   : > { %v2529_v28 = vpop.eup %2528  ;;  %v2172_v34 = vxor.u32 2147483648, %v2527_v16 }
 0x28d   : > { %v2169_v40 = vxor.u32 2147483648, %v2529_v28 }
 0x28e   : > { %v2173_v11 = vsel %vm2171_vm11, %v2172_v34, %v2529_v28 }
 0x28f   : > { %v2170_v63 = vsel %vm2168_vm13, %v2527_v16, %v2169_v40 }
 0x290   : > { %v2174_v21 = vsel %vm2167_vm14, %v2170_v63, %v2173_v11 }
 0x291   : > { %v2175_v3 = vsel %vm2164_vm0, nan, %v2174_v21 }
 0x292   : > { %2191 = vst [vmem:[%s3045_s8 + $0x78] sm:$0xff] %v2175_v3 }
 0x293   : > { %2543 = shalt.err (!%p2540_p3)
}
 0x294   : > { %s2544_s27 = scalar_lea.hbm %s3988_s19, 2048  ;;  %s2548_s30 = scalar_lea.hbm %s4040_s3, 4096 }
 0x295   : > { %p2545_p4 = scmp.ne.s32.totalorder %s3988_s19, %s2544_s27  ;;  %p2549_p9 = scmp.lt.u32.totalorder %s3988_s19, %s4040_s3 }
 0x296   : > { %p2550_p10 = scmp.lt.u32.totalorder %s2548_s30, %s2544_s27  ;;  %p2552_p12 = scmp.lt.u32.totalorder %s2544_s27, %s3988_s19 }
 0x297   : > { %p2546_p7 = pnand %p2545_p4, %p2664_p5 }
 0x298   : > { %p2551_p11 = por %p2550_p10, %p2549_p9 }
 0x299   : > { %p2547_p8 = pneg %p2546_p7 }
 0x29a   : > { %p2553_p13 = por %p2552_p12, %p2551_p11 }
 0x29c   : > { %p2554_p0 = pnand %p2553_p13, %p2547_p8 }
 0x29e   : > { %2557 = shalt.err (!%p2554_p0)
}
 0x29f   : > { %s2604_s6 = smov 128   ;;  %s2605_s7 = smov 8  }
 0x2a0   : > { %2410 = dma.vmem_to_hbm [thread:$0]  (%p2664_p5), %s3990_s10, 2048, %s3988_s19, %s3996_s16, %s2604_s6, %s2604_s6, %s2605_s7  }
 0x2a1 PF: > { %p2416_p1 = scmp.ge.s32.totalorder %s2592_s15, 2  ;;  %s2221_s8 = sand.u32 1, %s2580_s12  }
 0x2a2   : > { %s2222_s9 = scalar_lea.sflag [#allocation3], %s2221_s8 }
 0x2a3   : > { %p2413_p2 = pnand %p2416_p1, %p2668_p6 }
 0x2a5   : > { %2575 = dma.done.wait (!%p2413_p2), %s2222_s9, 2048  }
 0x2a6   : > { %2577 = vsyncadd (!%p2413_p2), %s2222_s9, 4294965248  ;;  %p13_p3 = scmp.ge.s32.totalorder %s2651_s18, 4   ;;  %s4071_s12 = smov %s2584_s13 }
 0x2a7   : > { %s4072_s13 = smov %s2588_s14  ;;  %s4073_s14 = smov %s2662_s21 }
 0x2a8   : > { %s4074_s15 = smov %s2651_s18  ;;  %15 = sbr.rel (!%p13_p3) target bundleno = 3 (0x3), region = 67 }
 0x2af   :  { %2227 = vsyncpa [#allocation3], 1 }
 0x2b0   :  { %2229 = vsyncpa [#allocation3 + $0x1], 1 }

</bundles_post_ra>
